<compile_context>
chip_gen: v6e
topology: v6e:2x2x1
jax: 0.10.0
libtpu: 0.0.40
codegen_flags: <defaults>
</compile_context>

<pallas_src>
import functools

import jax
import jax.numpy as jnp
import numpy as np
from jax import lax
from jax.experimental import pallas as pl
from jax.experimental.pallas import tpu as pltpu

# ESM-1b alphabet special tokens
CLS_TOKEN = 0
PAD_TOKEN = 1
EOS_TOKEN = 2

KSIZE = 5          # Conv1d kernel_size
PAD1 = 3           # padding of first Conv1d
PAD2 = 1           # padding of second Conv1d
C1 = 300           # first Conv1d out_channels (padded to 384 inside the kernel)
C2 = 21            # len('ACDEFGHIKLMNPQRSTVWY-')
OFF = 8            # 8-aligned row offset where the "body" starts in both
                   # padded scratch buffers (keeps the big per-step VMEM
                   # stores sublane-aligned)


def _round_up(x, m):
    return (x + m - 1) // m * m


def _head_kernel(tok_ref, enc_ref, w1_ref, b1_ref, w2_ref, b2_ref, out_ref,
                 xpad_ref, hpad_ref, acc1_ref, *, eos, pad):
    """Fused strip + mask + Conv1d(E->C1,k5,p3) + ReLU + Conv1d(C1->Cp,k5,p1).

    tok_ref : (Ltok, 1)    int32    full token row (incl. BOS / final token)
    enc_ref : (Ltok, E)    bfloat16 full ESM representation row
    w1_ref  : (K, E, C1p)  bfloat16 conv1 weight, tap-major, out-ch padded to 384
    b1_ref  : (1, C1p)     float32  (zero in the padded columns)
    w2_ref  : (K, C1p, Cp) bfloat16 conv2 weight, in-ch rows / out-ch padded
    b2_ref  : (1, Cp)      float32
    out_ref : (L, Cp)      float32  L = Ltok - 2 (wrapper slices Cp -> 21)
    xpad_ref: (Lp, E)      bfloat16 scratch; conv1 input at rows [OFF, OFF+Ltok)
    hpad_ref: (Lp, C1p)    bfloat16 scratch; conv1 output at rows [OFF, OFF+L1)
    acc1_ref: (L1, C1p)    float32  scratch; conv1 f32 accumulator
    """
    Ltok, E = enc_ref.shape
    L = out_ref.shape[0]
    K = w1_ref.shape[0]
    c1p = w1_ref.shape[2]
    cpad = w2_ref.shape[2]
    L1 = L + 2 * PAD1 - KSIZE + 1             # conv1 output length (= L + 2)

    # --- mask.  The torch strip x[:, 1:-1] is fused by also zeroing the BOS
    #     row and the final row: those rows then serve as conv zero-padding.
    tok = tok_ref[...]                                        # (Ltok, 1) int32
    pos = lax.broadcasted_iota(jnp.int32, tok.shape, 0)
    keep = jnp.logical_and(tok != eos, tok != pad)
    keep = jnp.logical_and(keep, pos > 0)
    keep = jnp.logical_and(keep, pos < Ltok - 1)
    maskf = keep.astype(enc_ref.dtype)                        # bf16 (Ltok, 1)

    # --- stage conv1 input.  Only the 4 halo rows the taps actually read are
    #     zeroed (tiny); the body store is 8-aligned.  Rows outside
    #     [OFF-2, OFF+Ltok+2) may hold stale VMEM: matmul rows are independent
    #     and those rows are sliced away below, so results are unaffected
    #     (costs ~1% extra MXU rows).
    xpad_ref[OFF - 2:OFF, :] = jnp.zeros((2, E), xpad_ref.dtype)
    xpad_ref[OFF + Ltok:OFF + Ltok + 2, :] = jnp.zeros((2, E), xpad_ref.dtype)
    xpad_ref[OFF:OFF + Ltok, :] = enc_ref[...] * maskf        # aligned store

    # --- Conv1d #1: K tap matmuls over the aligned, full xpad buffer.
    #     Bias-initialized f32 accumulation into a VMEM scratch ref, so each
    #     (Lp, C1p) f32 tap result dies before the next tap is issued.
    acc1_ref[...] = jnp.broadcast_to(b1_ref[...], (L1, c1p))
    xv = xpad_ref[...]
    for t in range(K):
        y = jnp.dot(xv, w1_ref[t], preferred_element_type=jnp.float32)
        acc1_ref[...] += y[OFF - 2 + t:OFF - 2 + t + L1, :]
        # TODO(synk): if the bundle dump shows sublane relayout on the shifted
        # adds, switch to pltpu.roll(y, shift=2-t, axis=0) + the 8-aligned
        # slice [OFF:OFF+L1] (wrapped rows land outside the slice).
    h = jnp.maximum(acc1_ref[...], 0.0)                       # bias + ReLU

    # --- stage conv2 input (2 halo rows + aligned body store, bf16,
    #     lane-dense 384-wide rows)
    hpad_ref[OFF - 1:OFF, :] = jnp.zeros((1, c1p), hpad_ref.dtype)
    hpad_ref[OFF + L1:OFF + L1 + 1, :] = jnp.zeros((1, c1p), hpad_ref.dtype)
    hpad_ref[OFF:OFF + L1, :] = h.astype(hpad_ref.dtype)

    # --- Conv1d #2: C1p -> Cp (lane-dense, zero-padded channels), accumulate
    #     straight into the output block (bias-initialized).
    out_ref[...] = jnp.broadcast_to(b2_ref[...], (L, cpad))
    hv = hpad_ref[...]
    for t in range(K):
        z = jnp.dot(hv, w2_ref[t], preferred_element_type=jnp.float32)
        out_ref[...] += z[OFF - 1 + t:OFF - 1 + t + L, :]


def esm2_to_3di_head(tokens, encoded, w1, b1, w2, b2):
    """Pallas implementation of ESM2_to_3Di.forward's head.

    tokens : (B, Ltok) int  token ids incl. BOS at [:,0] and EOS/PAD at the end
    encoded: (B, Ltok, E)   stand-in for ESM representations at repr_layer
    w1     : (K, E, C1)     torch conv1.weight transposed to tap-major
    b1     : (C1,)
    w2     : (K, C1, C2)
    b2     : (C2,)
    returns: (B, C2, L) float32 with L = Ltok - 2 (matches PyTorch NCW output)
    """
    B, Ltok = tokens.shape
    L = Ltok - 2
    L1 = L + 2
    E = encoded.shape[-1]
    K, _, c1 = w1.shape
    c2 = w2.shape[-1]
    c1p = _round_up(max(c1, 128), 128)         # 300 -> 384 (lane-dense)
    cpad = _round_up(max(c2, 128), 128)        # 21  -> 128 (lane-dense)
    Lp = _round_up(L + OFF + 4, 8)             # padded scratch length (>= L+12)

    # bf16 MXU inputs (in production the ESM trunk output is already bf16)
    enc_bf = encoded if encoded.dtype == jnp.bfloat16 else encoded.astype(jnp.bfloat16)
    tok3 = tokens.astype(jnp.int32)[..., None]                       # (B, Ltok, 1)
    w1p = jnp.zeros((K, E, c1p), jnp.bfloat16).at[:, :, :c1].set(
        w1.astype(jnp.bfloat16))
    b1p = jnp.zeros((1, c1p), jnp.float32).at[0, :c1].set(b1.astype(jnp.float32))
    w2p = jnp.zeros((K, c1p, cpad), jnp.bfloat16).at[:, :c1, :c2].set(
        w2.astype(jnp.bfloat16))
    b2p = jnp.zeros((1, cpad), jnp.float32).at[0, :c2].set(b2.astype(jnp.float32))

    # Generation-aware VMEM budget (v5e/v6e: 128 MiB, v7x: 64 MiB physical).
    try:
        vmem_cap = int(pltpu.get_tpu_info().vmem_capacity_bytes)
    except Exception:
        vmem_cap = 64 * 2 ** 20                # conservative (v7x-sized) default
    est = (2 * Ltok * E * 2                    # enc block (double-buffered, bf16)
           + 2 * Ltok * 128 * 4                # tok block (i32, lane padded)
           + 2 * L * cpad * 4                  # out block (double-buffered, f32)
           + 2 * (K * E * c1p + K * c1p * cpad) * 2   # weights (worst: 2 bufs)
           + 2 * (c1p + cpad) * 4              # biases
           + Lp * E * 2 + Lp * c1p * 2         # xpad / hpad scratch (bf16)
           + L1 * c1p * 4                      # conv1 f32 accumulator scratch
           + 2 * Lp * c1p * 4                  # in-flight conv1 f32 tap temps
           + 2 * Lp * cpad * 4                 # in-flight conv2 f32 tap temps
           + L1 * c1p * 4)                     # f32 h before bf16 cast
    vmem_limit = int(min(int(0.85 * vmem_cap), max(32 * 2 ** 20, 2 * est)))

    kernel = functools.partial(_head_kernel, eos=EOS_TOKEN, pad=PAD_TOKEN)

    def build(weight_pipeline_mode):
        wkw = ({} if weight_pipeline_mode is None
               else {"pipeline_mode": weight_pipeline_mode})
        grid_spec = pltpu.PrefetchScalarGridSpec(
            num_scalar_prefetch=0,
            grid=(B,),
            in_specs=[
                pl.BlockSpec((None, Ltok, 1), lambda b: (b, 0, 0)),      # tokens
                pl.BlockSpec((None, Ltok, E), lambda b: (b, 0, 0)),      # encoded
                pl.BlockSpec((K, E, c1p), lambda b: (0, 0, 0), **wkw),   # conv1 w
                pl.BlockSpec((1, c1p), lambda b: (0, 0), **wkw),         # conv1 b
                pl.BlockSpec((K, c1p, cpad), lambda b: (0, 0, 0), **wkw),  # conv2 w
                pl.BlockSpec((1, cpad), lambda b: (0, 0), **wkw),        # conv2 b
            ],
            out_specs=pl.BlockSpec((None, L, cpad), lambda b: (b, 0, 0)),
            scratch_shapes=[
                pltpu.VMEM((Lp, E), jnp.bfloat16),     # padded conv1 input
                pltpu.VMEM((Lp, c1p), jnp.bfloat16),   # padded conv2 input
                pltpu.VMEM((L1, c1p), jnp.float32),    # conv1 f32 accumulator
            ],
        )
        return pl.pallas_call(
            kernel,
            out_shape=jax.ShapeDtypeStruct((B, L, cpad), jnp.float32),
            grid_spec=grid_spec,
            compiler_params=pltpu.CompilerParams(
                dimension_semantics=("parallel",),
                vmem_limit_bytes=vmem_limit),
        )

    args = (tok3, enc_bf, w1p, b1p, w2p, b2p)

    # Feature-detect pipeline_mode / Buffered support instead of a broad
    # try/except around the real call (so genuine lowering errors surface).
    supports_buffered = hasattr(pl, "Buffered")
    if supports_buffered:
        try:
            pl.BlockSpec((8, 128), lambda b: (0, 0), pipeline_mode=pl.Buffered(1))
        except TypeError:
            supports_buffered = False

    fallback_errors = (TypeError, ValueError, NotImplementedError)
    if hasattr(pltpu, "LoweringException"):
        fallback_errors = fallback_errors + (pltpu.LoweringException,)

    if supports_buffered:
        try:
            # single-buffer the constant-index weight/bias blocks (fetched once)
            out = build(pl.Buffered(1))(*args)
        except fallback_errors:
            # this Pallas accepts pipeline_mode syntactically but rejects
            # single-buffering in lowering; rebuild double-buffered
            out = build(None)(*args)
    else:
        out = build(None)(*args)

    # back to PyTorch's (B, C_out, L) layout, dropping the lane padding
    return jnp.transpose(out, (0, 2, 1))[:, :c2, :]


def reference_forward(tokens, encoded, w1, b1, w2, b2):
    """Pure-JAX f32 reference mirroring the PyTorch forward (NCW convs)."""
    enc = encoded[:, 1:-1, :]
    x = tokens[:, 1:-1]
    mask = jnp.logical_and(x != EOS_TOKEN, x != PAD_TOKEN)
    enc = enc * mask[:, :, None].astype(enc.dtype)
    encT = jnp.transpose(enc, (0, 2, 1))                     # (B, E, L)
    w1_oih = jnp.transpose(w1, (2, 1, 0))                    # (C1, E, K)
    h = lax.conv_general_dilated(encT, w1_oih, window_strides=(1,),
                                 padding=[(PAD1, PAD1)],
                                 dimension_numbers=('NCH', 'OIH', 'NCH'))
    h = jax.nn.relu(h + b1[None, :, None])
    w2_oih = jnp.transpose(w2, (2, 1, 0))                    # (C2, C1, K)
    out = lax.conv_general_dilated(h, w2_oih, window_strides=(1,),
                                   padding=[(PAD2, PAD2)],
                                   dimension_numbers=('NCH', 'OIH', 'NCH'))
    return out + b2[None, :, None]


if __name__ == "__main__":
    # small, deterministic setup (E=32 stand-in for the ESM embedding dim)
    B, Ltok, E = 2, 10, 32
    key = jax.random.PRNGKey(0)
    k_tok, k_enc, k_w1, k_b1, k_w2, k_b2 = jax.random.split(key, 6)

    tokens = jax.random.randint(k_tok, (B, Ltok), 4, 24, dtype=jnp.int32)
    tokens = tokens.at[:, 0].set(CLS_TOKEN).at[:, -1].set(EOS_TOKEN)
    # make the 2nd sequence shorter: eos then pads inside the window
    tokens = tokens.at[1, 6].set(EOS_TOKEN).at[1, 7:].set(PAD_TOKEN)

    encoded = jax.random.normal(k_enc, (B, Ltok, E), jnp.float32)

    w1 = jax.random.normal(k_w1, (KSIZE, E, C1), jnp.float32) * 0.05
    b1 = jax.random.normal(k_b1, (C1,), jnp.float32) * 0.05
    w2 = jax.random.normal(k_w2, (KSIZE, C1, C2), jnp.float32) * 0.05
    b2 = jax.random.normal(k_b2, (C2,), jnp.float32) * 0.05

    out = jax.block_until_ready(
        esm2_to_3di_head(tokens, encoded, w1, b1, w2, b2))
    ref = jax.block_until_ready(
        reference_forward(tokens, encoded, w1, b1, w2, b2))

    assert out.shape == (B, C2, Ltok - 2), out.shape
    # bf16 MXU inputs -> slightly looser tolerance than the pure-f32 reference
    np.testing.assert_allclose(np.asarray(out), np.asarray(ref),
                               rtol=3e-2, atol=3e-2)
    print("KERNEL_OK")
</pallas_src>

<mosaic_0001>
module attributes {stable_mosaic.version = 11 : i64} {
  func.func @_head_kernel(%arg0: i32, %arg1: memref<1x10x1xi32, #tpu.memory_space<vmem>>, %arg2: memref<1x10x32xbf16, #tpu.memory_space<vmem>>, %arg3: memref<5x32x384xbf16, #tpu.memory_space<vmem>>, %arg4: memref<1x384xf32, #tpu.memory_space<vmem>>, %arg5: memref<5x384x128xbf16, #tpu.memory_space<vmem>>, %arg6: memref<1x128xf32, #tpu.memory_space<vmem>>, %arg7: memref<1x8x128xf32, #tpu.memory_space<vmem>>, %arg8: memref<24x32xbf16, #tpu.memory_space<vmem>>, %arg9: memref<24x384xbf16, #tpu.memory_space<vmem>>, %arg10: memref<10x384xf32, #tpu.memory_space<vmem>>) attributes {dimension_semantics = [#tpu.dimension_semantics<parallel>], iteration_bounds = array<i64: 2>, scalar_prefetch = 0 : i64, scratch_operands = 3 : i64, tpu.core_type = #tpu.core_type<tc>, window_params = [{transform_indices = @transform_0, window_bounds = array<i64: 1, 10, 1>}, {transform_indices = @transform_1, window_bounds = array<i64: 1, 10, 32>}, {pipeline_mode = #tpu.pipeline_mode<synchronous>, transform_indices = @transform_2, window_bounds = array<i64: 5, 32, 384>}, {pipeline_mode = #tpu.pipeline_mode<synchronous>, transform_indices = @transform_3, window_bounds = array<i64: 1, 384>}, {pipeline_mode = #tpu.pipeline_mode<synchronous>, transform_indices = @transform_4, window_bounds = array<i64: 5, 384, 128>}, {pipeline_mode = #tpu.pipeline_mode<synchronous>, transform_indices = @transform_5, window_bounds = array<i64: 1, 128>}, {transform_indices = @transform_6, window_bounds = array<i64: 1, 8, 128>}]} {
    %c0 = arith.constant 0 : index
    %c0_0 = arith.constant 0 : index
    %c0_1 = arith.constant 0 : index
    %0 = vector.load %arg1[%c0, %c0_0, %c0_1] : memref<1x10x1xi32, #tpu.memory_space<vmem>>, vector<1x10x1xi32>
    %1 = vector.shape_cast %0 : vector<1x10x1xi32> to vector<10x1xi32>
    %2 = tpu.iota {dimensions = array<i32: 0>} : vector<10x1xi32>
    %c2_i32 = arith.constant 2 : i32
    %3 = vector.broadcast %c2_i32 : i32 to vector<10x1xi32>
    %4 = arith.cmpi ne, %1, %3 : vector<10x1xi32>
    %c1_i32 = arith.constant 1 : i32
    %5 = vector.broadcast %c1_i32 : i32 to vector<10x1xi32>
    %6 = arith.cmpi ne, %1, %5 : vector<10x1xi32>
    %7 = arith.andi %4, %6 : vector<10x1xi1>
    %c0_i32 = arith.constant 0 : i32
    %8 = vector.broadcast %c0_i32 : i32 to vector<10x1xi32>
    %9 = arith.cmpi sgt, %2, %8 : vector<10x1xi32>
    %10 = arith.andi %7, %9 : vector<10x1xi1>
    %c9_i32 = arith.constant 9 : i32
    %11 = vector.broadcast %c9_i32 : i32 to vector<10x1xi32>
    %12 = arith.cmpi slt, %2, %11 : vector<10x1xi32>
    %13 = arith.andi %10, %12 : vector<10x1xi1>
    %14 = arith.extui %13 : vector<10x1xi1> to vector<10x1xi32>
    %15 = arith.sitofp %14 : vector<10x1xi32> to vector<10x1xf32>
    %16 = arith.truncf %15 : vector<10x1xf32> to vector<10x1xbf16>
    %cst = arith.constant 0.000000e+00 : bf16
    %17 = vector.broadcast %cst : bf16 to vector<2x32xbf16>
    %c6 = arith.constant 6 : index
    %c0_2 = arith.constant 0 : index
    %18 = vector.load %arg8[%c6, %c0_2] : memref<24x32xbf16, #tpu.memory_space<vmem>>, vector<2x32xbf16>
    tpu.vector_store %arg8[%c6, %c0_2], %17 {strides = array<i32>} : memref<24x32xbf16, #tpu.memory_space<vmem>>, vector<2x32xbf16>,
    %cst_3 = arith.constant 0.000000e+00 : bf16
    %19 = vector.broadcast %cst_3 : bf16 to vector<2x32xbf16>
    %c18 = arith.constant 18 : index
    %c0_4 = arith.constant 0 : index
    %20 = vector.load %arg8[%c18, %c0_4] : memref<24x32xbf16, #tpu.memory_space<vmem>>, vector<2x32xbf16>
    tpu.vector_store %arg8[%c18, %c0_4], %19 {strides = array<i32>} : memref<24x32xbf16, #tpu.memory_space<vmem>>, vector<2x32xbf16>,
    %c0_5 = arith.constant 0 : index
    %c0_6 = arith.constant 0 : index
    %c0_7 = arith.constant 0 : index
    %21 = vector.load %arg2[%c0_5, %c0_6, %c0_7] : memref<1x10x32xbf16, #tpu.memory_space<vmem>>, vector<1x10x32xbf16>
    %22 = vector.shape_cast %21 : vector<1x10x32xbf16> to vector<10x32xbf16>
    %23 = vector.broadcast %16 : vector<10x1xbf16> to vector<10x32xbf16>
    %24 = arith.mulf %22, %23 : vector<10x32xbf16>
    %c8 = arith.constant 8 : index
    %c0_8 = arith.constant 0 : index
    %25 = vector.load %arg8[%c8, %c0_8] : memref<24x32xbf16, #tpu.memory_space<vmem>>, vector<10x32xbf16>
    tpu.vector_store %arg8[%c8, %c0_8], %24 {strides = array<i32>} : memref<24x32xbf16, #tpu.memory_space<vmem>>, vector<10x32xbf16>,
    %c0_9 = arith.constant 0 : index
    %c0_10 = arith.constant 0 : index
    %26 = vector.load %arg4[%c0_9, %c0_10] : memref<1x384xf32, #tpu.memory_space<vmem>>, vector<1x384xf32>
    %27 = vector.shape_cast %26 : vector<1x384xf32> to vector<1x384xf32>
    %28 = vector.broadcast %27 : vector<1x384xf32> to vector<10x384xf32>
    %c0_11 = arith.constant 0 : index
    %c0_12 = arith.constant 0 : index
    %29 = vector.load %arg10[%c0_11, %c0_12] : memref<10x384xf32, #tpu.memory_space<vmem>>, vector<10x384xf32>
    tpu.vector_store %arg10[%c0_11, %c0_12], %28 {strides = array<i32>} : memref<10x384xf32, #tpu.memory_space<vmem>>, vector<10x384xf32>,
    %c0_13 = arith.constant 0 : index
    %c0_14 = arith.constant 0 : index
    %30 = vector.load %arg8[%c0_13, %c0_14] : memref<24x32xbf16, #tpu.memory_space<vmem>>, vector<24x32xbf16>
    %c0_15 = arith.constant 0 : index
    %c0_16 = arith.constant 0 : index
    %c0_17 = arith.constant 0 : index
    %31 = vector.load %arg3[%c0_15, %c0_16, %c0_17] : memref<5x32x384xbf16, #tpu.memory_space<vmem>>, vector<1x32x384xbf16>
    %32 = vector.shape_cast %31 : vector<1x32x384xbf16> to vector<32x384xbf16>
    %cst_18 = arith.constant dense<0.000000e+00> : vector<24x384xf32>
    %33 = tpu.matmul %30, %32, %cst_18 {dimension_numbers = #tpu.dot_dimension_numbers<[1], [0], [0], [1], [0, 0, 1, 1], [], []>} : vector<24x32xbf16>, vector<32x384xbf16>, vector<24x384xf32> -> vector<24x384xf32>
    %c0_19 = arith.constant 0 : index
    %c0_20 = arith.constant 0 : index
    %34 = vector.load %arg10[%c0_19, %c0_20] : memref<10x384xf32, #tpu.memory_space<vmem>>, vector<10x384xf32>
    %35 = vector.extract_strided_slice %33 {offsets = [6, 0], sizes = [10, 384], strides = [1, 1]} : vector<24x384xf32> to vector<10x384xf32>
    %36 = arith.addf %34, %35 : vector<10x384xf32>
    %c0_21 = arith.constant 0 : index
    %c0_22 = arith.constant 0 : index
    %37 = vector.load %arg10[%c0_21, %c0_22] : memref<10x384xf32, #tpu.memory_space<vmem>>, vector<10x384xf32>
    tpu.vector_store %arg10[%c0_21, %c0_22], %36 {strides = array<i32>} : memref<10x384xf32, #tpu.memory_space<vmem>>, vector<10x384xf32>,
    %c1 = arith.constant 1 : index
    %c0_23 = arith.constant 0 : index
    %c0_24 = arith.constant 0 : index
    %38 = vector.load %arg3[%c1, %c0_23, %c0_24] : memref<5x32x384xbf16, #tpu.memory_space<vmem>>, vector<1x32x384xbf16>
    %39 = vector.shape_cast %38 : vector<1x32x384xbf16> to vector<32x384xbf16>
    %cst_25 = arith.constant dense<0.000000e+00> : vector<24x384xf32>
    %40 = tpu.matmul %30, %39, %cst_25 {dimension_numbers = #tpu.dot_dimension_numbers<[1], [0], [0], [1], [0, 0, 1, 1], [], []>} : vector<24x32xbf16>, vector<32x384xbf16>, vector<24x384xf32> -> vector<24x384xf32>
    %c0_26 = arith.constant 0 : index
    %c0_27 = arith.constant 0 : index
    %41 = vector.load %arg10[%c0_26, %c0_27] : memref<10x384xf32, #tpu.memory_space<vmem>>, vector<10x384xf32>
    %42 = vector.extract_strided_slice %40 {offsets = [7, 0], sizes = [10, 384], strides = [1, 1]} : vector<24x384xf32> to vector<10x384xf32>
    %43 = arith.addf %41, %42 : vector<10x384xf32>
    %c0_28 = arith.constant 0 : index
    %c0_29 = arith.constant 0 : index
    %44 = vector.load %arg10[%c0_28, %c0_29] : memref<10x384xf32, #tpu.memory_space<vmem>>, vector<10x384xf32>
    tpu.vector_store %arg10[%c0_28, %c0_29], %43 {strides = array<i32>} : memref<10x384xf32, #tpu.memory_space<vmem>>, vector<10x384xf32>,
    %c2 = arith.constant 2 : index
    %c0_30 = arith.constant 0 : index
    %c0_31 = arith.constant 0 : index
    %45 = vector.load %arg3[%c2, %c0_30, %c0_31] : memref<5x32x384xbf16, #tpu.memory_space<vmem>>, vector<1x32x384xbf16>
    %46 = vector.shape_cast %45 : vector<1x32x384xbf16> to vector<32x384xbf16>
    %cst_32 = arith.constant dense<0.000000e+00> : vector<24x384xf32>
    %47 = tpu.matmul %30, %46, %cst_32 {dimension_numbers = #tpu.dot_dimension_numbers<[1], [0], [0], [1], [0, 0, 1, 1], [], []>} : vector<24x32xbf16>, vector<32x384xbf16>, vector<24x384xf32> -> vector<24x384xf32>
    %c0_33 = arith.constant 0 : index
    %c0_34 = arith.constant 0 : index
    %48 = vector.load %arg10[%c0_33, %c0_34] : memref<10x384xf32, #tpu.memory_space<vmem>>, vector<10x384xf32>
    %49 = vector.extract_strided_slice %47 {offsets = [8, 0], sizes = [10, 384], strides = [1, 1]} : vector<24x384xf32> to vector<10x384xf32>
    %50 = arith.addf %48, %49 : vector<10x384xf32>
    %c0_35 = arith.constant 0 : index
    %c0_36 = arith.constant 0 : index
    %51 = vector.load %arg10[%c0_35, %c0_36] : memref<10x384xf32, #tpu.memory_space<vmem>>, vector<10x384xf32>
    tpu.vector_store %arg10[%c0_35, %c0_36], %50 {strides = array<i32>} : memref<10x384xf32, #tpu.memory_space<vmem>>, vector<10x384xf32>,
    %c3 = arith.constant 3 : index
    %c0_37 = arith.constant 0 : index
    %c0_38 = arith.constant 0 : index
    %52 = vector.load %arg3[%c3, %c0_37, %c0_38] : memref<5x32x384xbf16, #tpu.memory_space<vmem>>, vector<1x32x384xbf16>
    %53 = vector.shape_cast %52 : vector<1x32x384xbf16> to vector<32x384xbf16>
    %cst_39 = arith.constant dense<0.000000e+00> : vector<24x384xf32>
    %54 = tpu.matmul %30, %53, %cst_39 {dimension_numbers = #tpu.dot_dimension_numbers<[1], [0], [0], [1], [0, 0, 1, 1], [], []>} : vector<24x32xbf16>, vector<32x384xbf16>, vector<24x384xf32> -> vector<24x384xf32>
    %c0_40 = arith.constant 0 : index
    %c0_41 = arith.constant 0 : index
    %55 = vector.load %arg10[%c0_40, %c0_41] : memref<10x384xf32, #tpu.memory_space<vmem>>, vector<10x384xf32>
    %56 = vector.extract_strided_slice %54 {offsets = [9, 0], sizes = [10, 384], strides = [1, 1]} : vector<24x384xf32> to vector<10x384xf32>
    %57 = arith.addf %55, %56 : vector<10x384xf32>
    %c0_42 = arith.constant 0 : index
    %c0_43 = arith.constant 0 : index
    %58 = vector.load %arg10[%c0_42, %c0_43] : memref<10x384xf32, #tpu.memory_space<vmem>>, vector<10x384xf32>
    tpu.vector_store %arg10[%c0_42, %c0_43], %57 {strides = array<i32>} : memref<10x384xf32, #tpu.memory_space<vmem>>, vector<10x384xf32>,
    %c4 = arith.constant 4 : index
    %c0_44 = arith.constant 0 : index
    %c0_45 = arith.constant 0 : index
    %59 = vector.load %arg3[%c4, %c0_44, %c0_45] : memref<5x32x384xbf16, #tpu.memory_space<vmem>>, vector<1x32x384xbf16>
    %60 = vector.shape_cast %59 : vector<1x32x384xbf16> to vector<32x384xbf16>
    %cst_46 = arith.constant dense<0.000000e+00> : vector<24x384xf32>
    %61 = tpu.matmul %30, %60, %cst_46 {dimension_numbers = #tpu.dot_dimension_numbers<[1], [0], [0], [1], [0, 0, 1, 1], [], []>} : vector<24x32xbf16>, vector<32x384xbf16>, vector<24x384xf32> -> vector<24x384xf32>
    %c0_47 = arith.constant 0 : index
    %c0_48 = arith.constant 0 : index
    %62 = vector.load %arg10[%c0_47, %c0_48] : memref<10x384xf32, #tpu.memory_space<vmem>>, vector<10x384xf32>
    %63 = vector.extract_strided_slice %61 {offsets = [10, 0], sizes = [10, 384], strides = [1, 1]} : vector<24x384xf32> to vector<10x384xf32>
    %64 = arith.addf %62, %63 : vector<10x384xf32>
    %c0_49 = arith.constant 0 : index
    %c0_50 = arith.constant 0 : index
    %65 = vector.load %arg10[%c0_49, %c0_50] : memref<10x384xf32, #tpu.memory_space<vmem>>, vector<10x384xf32>
    tpu.vector_store %arg10[%c0_49, %c0_50], %64 {strides = array<i32>} : memref<10x384xf32, #tpu.memory_space<vmem>>, vector<10x384xf32>,
    %c0_51 = arith.constant 0 : index
    %c0_52 = arith.constant 0 : index
    %66 = vector.load %arg10[%c0_51, %c0_52] : memref<10x384xf32, #tpu.memory_space<vmem>>, vector<10x384xf32>
    %cst_53 = arith.constant 0.000000e+00 : f32
    %67 = vector.broadcast %cst_53 : f32 to vector<10x384xf32>
    %68 = arith.maximumf %66, %67 : vector<10x384xf32>
    %cst_54 = arith.constant 0.000000e+00 : bf16
    %69 = vector.broadcast %cst_54 : bf16 to vector<1x384xbf16>
    %c7 = arith.constant 7 : index
    %c0_55 = arith.constant 0 : index
    %70 = vector.load %arg9[%c7, %c0_55] : memref<24x384xbf16, #tpu.memory_space<vmem>>, vector<1x384xbf16>
    tpu.vector_store %arg9[%c7, %c0_55], %69 {strides = array<i32>} : memref<24x384xbf16, #tpu.memory_space<vmem>>, vector<1x384xbf16>,
    %cst_56 = arith.constant 0.000000e+00 : bf16
    %71 = vector.broadcast %cst_56 : bf16 to vector<1x384xbf16>
    %c18_57 = arith.constant 18 : index
    %c0_58 = arith.constant 0 : index
    %72 = vector.load %arg9[%c18_57, %c0_58] : memref<24x384xbf16, #tpu.memory_space<vmem>>, vector<1x384xbf16>
    tpu.vector_store %arg9[%c18_57, %c0_58], %71 {strides = array<i32>} : memref<24x384xbf16, #tpu.memory_space<vmem>>, vector<1x384xbf16>,
    %73 = arith.truncf %68 : vector<10x384xf32> to vector<10x384xbf16>
    %c8_59 = arith.constant 8 : index
    %c0_60 = arith.constant 0 : index
    %74 = vector.load %arg9[%c8_59, %c0_60] : memref<24x384xbf16, #tpu.memory_space<vmem>>, vector<10x384xbf16>
    tpu.vector_store %arg9[%c8_59, %c0_60], %73 {strides = array<i32>} : memref<24x384xbf16, #tpu.memory_space<vmem>>, vector<10x384xbf16>,
    %c0_61 = arith.constant 0 : index
    %c0_62 = arith.constant 0 : index
    %75 = vector.load %arg6[%c0_61, %c0_62] : memref<1x128xf32, #tpu.memory_space<vmem>>, vector<1x128xf32>
    %76 = vector.shape_cast %75 : vector<1x128xf32> to vector<1x128xf32>
    %77 = vector.broadcast %76 : vector<1x128xf32> to vector<8x128xf32>
    %c0_63 = arith.constant 0 : index
    %c0_64 = arith.constant 0 : index
    %c0_65 = arith.constant 0 : index
    %78 = vector.load %arg7[%c0_63, %c0_64, %c0_65] : memref<1x8x128xf32, #tpu.memory_space<vmem>>, vector<1x8x128xf32>
    %79 = vector.shape_cast %78 : vector<1x8x128xf32> to vector<8x128xf32>
    %80 = vector.shape_cast %77 : vector<8x128xf32> to vector<1x8x128xf32>
    tpu.vector_store %arg7[%c0_63, %c0_64, %c0_65], %80 {strides = array<i32>} : memref<1x8x128xf32, #tpu.memory_space<vmem>>, vector<1x8x128xf32>,
    %c0_66 = arith.constant 0 : index
    %c0_67 = arith.constant 0 : index
    %81 = vector.load %arg9[%c0_66, %c0_67] : memref<24x384xbf16, #tpu.memory_space<vmem>>, vector<24x384xbf16>
    %c0_68 = arith.constant 0 : index
    %c0_69 = arith.constant 0 : index
    %c0_70 = arith.constant 0 : index
    %82 = vector.load %arg5[%c0_68, %c0_69, %c0_70] : memref<5x384x128xbf16, #tpu.memory_space<vmem>>, vector<1x384x128xbf16>
    %83 = vector.shape_cast %82 : vector<1x384x128xbf16> to vector<384x128xbf16>
    %cst_71 = arith.constant dense<0.000000e+00> : vector<24x128xf32>
    %84 = tpu.matmul %81, %83, %cst_71 {dimension_numbers = #tpu.dot_dimension_numbers<[1], [0], [0], [1], [0, 0, 1, 1], [], []>} : vector<24x384xbf16>, vector<384x128xbf16>, vector<24x128xf32> -> vector<24x128xf32>
    %c0_72 = arith.constant 0 : index
    %c0_73 = arith.constant 0 : index
    %c0_74 = arith.constant 0 : index
    %85 = vector.load %arg7[%c0_72, %c0_73, %c0_74] : memref<1x8x128xf32, #tpu.memory_space<vmem>>, vector<1x8x128xf32>
    %86 = vector.shape_cast %85 : vector<1x8x128xf32> to vector<8x128xf32>
    %87 = vector.extract_strided_slice %84 {offsets = [7, 0], sizes = [8, 128], strides = [1, 1]} : vector<24x128xf32> to vector<8x128xf32>
    %88 = arith.addf %86, %87 : vector<8x128xf32>
    %c0_75 = arith.constant 0 : index
    %c0_76 = arith.constant 0 : index
    %c0_77 = arith.constant 0 : index
    %89 = vector.load %arg7[%c0_75, %c0_76, %c0_77] : memref<1x8x128xf32, #tpu.memory_space<vmem>>, vector<1x8x128xf32>
    %90 = vector.shape_cast %89 : vector<1x8x128xf32> to vector<8x128xf32>
    %91 = vector.shape_cast %88 : vector<8x128xf32> to vector<1x8x128xf32>
    tpu.vector_store %arg7[%c0_75, %c0_76, %c0_77], %91 {strides = array<i32>} : memref<1x8x128xf32, #tpu.memory_space<vmem>>, vector<1x8x128xf32>,
    %c1_78 = arith.constant 1 : index
    %c0_79 = arith.constant 0 : index
    %c0_80 = arith.constant 0 : index
    %92 = vector.load %arg5[%c1_78, %c0_79, %c0_80] : memref<5x384x128xbf16, #tpu.memory_space<vmem>>, vector<1x384x128xbf16>
    %93 = vector.shape_cast %92 : vector<1x384x128xbf16> to vector<384x128xbf16>
    %cst_81 = arith.constant dense<0.000000e+00> : vector<24x128xf32>
    %94 = tpu.matmul %81, %93, %cst_81 {dimension_numbers = #tpu.dot_dimension_numbers<[1], [0], [0], [1], [0, 0, 1, 1], [], []>} : vector<24x384xbf16>, vector<384x128xbf16>, vector<24x128xf32> -> vector<24x128xf32>
    %c0_82 = arith.constant 0 : index
    %c0_83 = arith.constant 0 : index
    %c0_84 = arith.constant 0 : index
    %95 = vector.load %arg7[%c0_82, %c0_83, %c0_84] : memref<1x8x128xf32, #tpu.memory_space<vmem>>, vector<1x8x128xf32>
    %96 = vector.shape_cast %95 : vector<1x8x128xf32> to vector<8x128xf32>
    %97 = vector.extract_strided_slice %94 {offsets = [8, 0], sizes = [8, 128], strides = [1, 1]} : vector<24x128xf32> to vector<8x128xf32>
    %98 = arith.addf %96, %97 : vector<8x128xf32>
    %c0_85 = arith.constant 0 : index
    %c0_86 = arith.constant 0 : index
    %c0_87 = arith.constant 0 : index
    %99 = vector.load %arg7[%c0_85, %c0_86, %c0_87] : memref<1x8x128xf32, #tpu.memory_space<vmem>>, vector<1x8x128xf32>
    %100 = vector.shape_cast %99 : vector<1x8x128xf32> to vector<8x128xf32>
    %101 = vector.shape_cast %98 : vector<8x128xf32> to vector<1x8x128xf32>
    tpu.vector_store %arg7[%c0_85, %c0_86, %c0_87], %101 {strides = array<i32>} : memref<1x8x128xf32, #tpu.memory_space<vmem>>, vector<1x8x128xf32>,
    %c2_88 = arith.constant 2 : index
    %c0_89 = arith.constant 0 : index
    %c0_90 = arith.constant 0 : index
    %102 = vector.load %arg5[%c2_88, %c0_89, %c0_90] : memref<5x384x128xbf16, #tpu.memory_space<vmem>>, vector<1x384x128xbf16>
    %103 = vector.shape_cast %102 : vector<1x384x128xbf16> to vector<384x128xbf16>
    %cst_91 = arith.constant dense<0.000000e+00> : vector<24x128xf32>
    %104 = tpu.matmul %81, %103, %cst_91 {dimension_numbers = #tpu.dot_dimension_numbers<[1], [0], [0], [1], [0, 0, 1, 1], [], []>} : vector<24x384xbf16>, vector<384x128xbf16>, vector<24x128xf32> -> vector<24x128xf32>
    %c0_92 = arith.constant 0 : index
    %c0_93 = arith.constant 0 : index
    %c0_94 = arith.constant 0 : index
    %105 = vector.load %arg7[%c0_92, %c0_93, %c0_94] : memref<1x8x128xf32, #tpu.memory_space<vmem>>, vector<1x8x128xf32>
    %106 = vector.shape_cast %105 : vector<1x8x128xf32> to vector<8x128xf32>
    %107 = vector.extract_strided_slice %104 {offsets = [9, 0], sizes = [8, 128], strides = [1, 1]} : vector<24x128xf32> to vector<8x128xf32>
    %108 = arith.addf %106, %107 : vector<8x128xf32>
    %c0_95 = arith.constant 0 : index
    %c0_96 = arith.constant 0 : index
    %c0_97 = arith.constant 0 : index
    %109 = vector.load %arg7[%c0_95, %c0_96, %c0_97] : memref<1x8x128xf32, #tpu.memory_space<vmem>>, vector<1x8x128xf32>
    %110 = vector.shape_cast %109 : vector<1x8x128xf32> to vector<8x128xf32>
    %111 = vector.shape_cast %108 : vector<8x128xf32> to vector<1x8x128xf32>
    tpu.vector_store %arg7[%c0_95, %c0_96, %c0_97], %111 {strides = array<i32>} : memref<1x8x128xf32, #tpu.memory_space<vmem>>, vector<1x8x128xf32>,
    %c3_98 = arith.constant 3 : index
    %c0_99 = arith.constant 0 : index
    %c0_100 = arith.constant 0 : index
    %112 = vector.load %arg5[%c3_98, %c0_99, %c0_100] : memref<5x384x128xbf16, #tpu.memory_space<vmem>>, vector<1x384x128xbf16>
    %113 = vector.shape_cast %112 : vector<1x384x128xbf16> to vector<384x128xbf16>
    %cst_101 = arith.constant dense<0.000000e+00> : vector<24x128xf32>
    %114 = tpu.matmul %81, %113, %cst_101 {dimension_numbers = #tpu.dot_dimension_numbers<[1], [0], [0], [1], [0, 0, 1, 1], [], []>} : vector<24x384xbf16>, vector<384x128xbf16>, vector<24x128xf32> -> vector<24x128xf32>
    %c0_102 = arith.constant 0 : index
    %c0_103 = arith.constant 0 : index
    %c0_104 = arith.constant 0 : index
    %115 = vector.load %arg7[%c0_102, %c0_103, %c0_104] : memref<1x8x128xf32, #tpu.memory_space<vmem>>, vector<1x8x128xf32>
    %116 = vector.shape_cast %115 : vector<1x8x128xf32> to vector<8x128xf32>
    %117 = vector.extract_strided_slice %114 {offsets = [10, 0], sizes = [8, 128], strides = [1, 1]} : vector<24x128xf32> to vector<8x128xf32>
    %118 = arith.addf %116, %117 : vector<8x128xf32>
    %c0_105 = arith.constant 0 : index
    %c0_106 = arith.constant 0 : index
    %c0_107 = arith.constant 0 : index
    %119 = vector.load %arg7[%c0_105, %c0_106, %c0_107] : memref<1x8x128xf32, #tpu.memory_space<vmem>>, vector<1x8x128xf32>
    %120 = vector.shape_cast %119 : vector<1x8x128xf32> to vector<8x128xf32>
    %121 = vector.shape_cast %118 : vector<8x128xf32> to vector<1x8x128xf32>
    tpu.vector_store %arg7[%c0_105, %c0_106, %c0_107], %121 {strides = array<i32>} : memref<1x8x128xf32, #tpu.memory_space<vmem>>, vector<1x8x128xf32>,
    %c4_108 = arith.constant 4 : index
    %c0_109 = arith.constant 0 : index
    %c0_110 = arith.constant 0 : index
    %122 = vector.load %arg5[%c4_108, %c0_109, %c0_110] : memref<5x384x128xbf16, #tpu.memory_space<vmem>>, vector<1x384x128xbf16>
    %123 = vector.shape_cast %122 : vector<1x384x128xbf16> to vector<384x128xbf16>
    %cst_111 = arith.constant dense<0.000000e+00> : vector<24x128xf32>
    %124 = tpu.matmul %81, %123, %cst_111 {dimension_numbers = #tpu.dot_dimension_numbers<[1], [0], [0], [1], [0, 0, 1, 1], [], []>} : vector<24x384xbf16>, vector<384x128xbf16>, vector<24x128xf32> -> vector<24x128xf32>
    %c0_112 = arith.constant 0 : index
    %c0_113 = arith.constant 0 : index
    %c0_114 = arith.constant 0 : index
    %125 = vector.load %arg7[%c0_112, %c0_113, %c0_114] : memref<1x8x128xf32, #tpu.memory_space<vmem>>, vector<1x8x128xf32>
    %126 = vector.shape_cast %125 : vector<1x8x128xf32> to vector<8x128xf32>
    %127 = vector.extract_strided_slice %124 {offsets = [11, 0], sizes = [8, 128], strides = [1, 1]} : vector<24x128xf32> to vector<8x128xf32>
    %128 = arith.addf %126, %127 : vector<8x128xf32>
    %c0_115 = arith.constant 0 : index
    %c0_116 = arith.constant 0 : index
    %c0_117 = arith.constant 0 : index
    %129 = vector.load %arg7[%c0_115, %c0_116, %c0_117] : memref<1x8x128xf32, #tpu.memory_space<vmem>>, vector<1x8x128xf32>
    %130 = vector.shape_cast %129 : vector<1x8x128xf32> to vector<8x128xf32>
    %131 = vector.shape_cast %128 : vector<8x128xf32> to vector<1x8x128xf32>
    tpu.vector_store %arg7[%c0_115, %c0_116, %c0_117], %131 {strides = array<i32>} : memref<1x8x128xf32, #tpu.memory_space<vmem>>, vector<1x8x128xf32>,
    return
  }
  func.func @transform_0(%arg0: i32) -> (i32, i32, i32) {
    %c0_i32 = arith.constant 0 : i32
    %c0_i32_0 = arith.constant 0 : i32
    %c0_i32_1 = arith.constant 0 : i32
    return %arg0, %c0_i32, %c0_i32_0 : i32, i32, i32
  }
  func.func @transform_1(%arg0: i32) -> (i32, i32, i32) {
    %c0_i32 = arith.constant 0 : i32
    %c0_i32_0 = arith.constant 0 : i32
    %c0_i32_1 = arith.constant 0 : i32
    return %arg0, %c0_i32, %c0_i32_0 : i32, i32, i32
  }
  func.func @transform_2(%arg0: i32) -> (i32, i32, i32) {
    %c0_i32 = arith.constant 0 : i32
    %c0_i32_0 = arith.constant 0 : i32
    %c0_i32_1 = arith.constant 0 : i32
    %c0_i32_2 = arith.constant 0 : i32
    return %c0_i32, %c0_i32_0, %c0_i32_1 : i32, i32, i32
  }
  func.func @transform_3(%arg0: i32) -> (i32, i32) {
    %c0_i32 = arith.constant 0 : i32
    %c0_i32_0 = arith.constant 0 : i32
    %c0_i32_1 = arith.constant 0 : i32
    return %c0_i32, %c0_i32_0 : i32, i32
  }
  func.func @transform_4(%arg0: i32) -> (i32, i32, i32) {
    %c0_i32 = arith.constant 0 : i32
    %c0_i32_0 = arith.constant 0 : i32
    %c0_i32_1 = arith.constant 0 : i32
    %c0_i32_2 = arith.constant 0 : i32
    return %c0_i32, %c0_i32_0, %c0_i32_1 : i32, i32, i32
  }
  func.func @transform_5(%arg0: i32) -> (i32, i32) {
    %c0_i32 = arith.constant 0 : i32
    %c0_i32_0 = arith.constant 0 : i32
    %c0_i32_1 = arith.constant 0 : i32
    return %c0_i32, %c0_i32_0 : i32, i32
  }
  func.func @transform_6(%arg0: i32) -> (i32, i32, i32) {
    %c0_i32 = arith.constant 0 : i32
    %c0_i32_0 = arith.constant 0 : i32
    %c0_i32_1 = arith.constant 0 : i32
    return %arg0, %c0_i32, %c0_i32_0 : i32, i32, i32
  }
}

</mosaic_0001>

<bundles_post_ra>
// kernel: tpu_custom_call.1
= control target key start
LH: loop header
LB: loop body
LE: loop exit
PB: predicated region body
PF: predicated region fallthrough
CT: control target
= control target key end

     0   :  { %11 = vsyncpa [#allocation6], 0  ;;  %s4289_s0 = inlined_call_operand.vmem [shape: s32[2,10,1], index: 0, kind: input, shape index: {}]   ;;  %s4290_s1 = inlined_call_operand.vmem [shape: bf16[2,10,32], index: 1, kind: input, shape index: {}]   ;;  %s4291_s2 = inlined_call_operand.hbm [shape: bf16[5,32,384], index: 2, kind: input, shape index: {}]   ;;  %s4292_s3 = inlined_call_operand.vmem [shape: f32[1,384], index: 3, kind: input, shape index: {}]   ;;  %s4293_s4 = inlined_call_operand.hbm [shape: bf16[5,384,128], index: 4, kind: input, shape index: {}]   ;;  %s4294_s5 = inlined_call_operand.vmem [shape: f32[1,128], index: 5, kind: input, shape index: {}]   ;;  %s4295_s6 = inlined_call_operand.hbm [shape: f32[2,8,128], index: 6, kind: output, shape index: {}]  }
   0x1   :  { %12 = vsyncpa [#allocation9], 0 }
   0x2   :  { %13 = vsyncpa [#allocation7], 0 }
   0x3   :  { %15 = vsyncpa [#allocation7 + $0x1], 0  ;;  %s3915_s21 = smov 0   ;;  %s3917_s22 = smov 0  }
   0x4   :  { %s3919_s23 = smov 0   ;;  %s3921_s24 = smov 0  }
   0x5 LB: > { %s3936_s25 = sadd.s32 4294967295, %s3867_s24   ;;  %s2955_s26 = sadd.s32 4294967294, %s3867_s24   ;;  %s3867_s24 = sphi %s3921_s24, %s4313_s24   ;;  %s3863_s23 = sphi %s3919_s23, %s4312_s23   ;;  %s3859_s22 = sphi %s3917_s22, %s4311_s22   ;;  %s3855_s21 = sphi %s3915_s21, %s4310_s21  }
   0x6   : > { %s3940_s27 = sadd.s32 1, %s3867_s24   ;;  %s164_s28 = sadd.s32 1, %s3863_s23 }
   0x7   : > { %s161_s29 = ssub.s32 %s3867_s24, %s3940_s27  ;;  %p174_p0 = scmp.ne.s32.totalorder %s3863_s23, %s3859_s22 }
   0x8   : > { %p162_p1 = scmp.eq.s32.totalorder %s161_s29, 0  ;;  %p175_p2 = scmp.eq.s32.totalorder %s3936_s25, 1 }
   0x9   : > { %p180_p3 = scmp.ne.s32.totalorder %s3859_s22, %s3855_s21  ;;  %p181_p4 = scmp.eq.s32.totalorder %s2955_s26, 1 }
   0xa   : > { %s3951_s30 = scalar_select %p162_p1, %s3863_s23, %s164_s28  }
   0xb   : > { %p3953_p5 = por %p175_p2, %p174_p0  ;;  %p3957_p6 = por %p181_p4, %p180_p3 }
   0xc   : > { %p2956_p7 = scmp.ge.s32.totalorder %s3867_s24, 1  ;;  %p188_p8 = scmp.lt.s32.totalorder %s3867_s24, 3 }
   0xd   : > { %s4298_s8 = scalar_select %p3957_p6, 1, 0 }
   0xe   : > { %p4296_p9 = scmp.eq.s32.totalorder %s3936_s25, 0  ;;  %p3964_p10 = pnand %p2956_p7, %p188_p8 }
   0xf   : > { %s3869_s10 = smov [#allocation5]   ;;  %s3870_s13 = smov [#allocation8]  }
  0x10   : > { %s200_s11 = sshll.u32 %s3869_s10, 4  ;;  %p3523_p11 = pneg %p3964_p10  ;;  %s201_s11 = int_to_ptr.vmem [resolvable:$true] %s200_s11 }
  0x11   : > { %s216_s14 = sshll.u32 %s3870_s13, 4  ;;  %s3758_s15 = scalar_lea.vmem %s201_s11, 3840  ;;  %s217_s14 = int_to_ptr.vmem [resolvable:$true] %s216_s14 }
  0x12   : > { %p3972_p12 = pnand %p4296_p9, %p3523_p11  ;;  %p3759_p0 = scmp.ne.s32.totalorder %s201_s11, %s3758_s15 }
  0x13   : > { %p3766_p3 = scmp.lt.s32.totalorder %s201_s11, %s201_s11  ;;  %p3767_p4 = scmp.lt.s32.totalorder %s3758_s15, %s3758_s15 }
  0x14   : > { %p3749_p13 = pneg %p3972_p12 }
  0x15   : > { %p3768_p7 = por %p3767_p4, %p3766_p3 }
  0x16   : > { %p3761_p1 = pnand %p3759_p0, %p3749_p13 }
  0x18   : > { %p3762_p2 = pneg %p3761_p1 }
  0x1a   : > { %p3769_p8 = pnand %p3768_p7, %p3762_p2 }
  0x1c   : > { %3772 = shalt.err (!%p3769_p8)
}
  0x1d   : > { %s3871_s16 = smov 192   ;;  %s3872_s17 = smov 12  }
  0x1e   : > { %3526 = dma.hbm_to_vmem [thread:$0]  (!%p3972_p12), %s4291_s2, 3840, %s201_s11, [#allocation6], %s3871_s16, %s3871_s16, %s3872_s17  }
  0x1f   : > { %s3784_s20 = scalar_lea.vmem %s217_s14, 15360  ;;  %p3792_p9 = scmp.lt.s32.totalorder %s217_s14, %s217_s14 }
  0x20   : > { %p3785_p11 = scmp.ne.s32.totalorder %s217_s14, %s3784_s20  ;;  %p3793_p6 = scmp.lt.s32.totalorder %s3784_s20, %s3784_s20 }
  0x22   : > { %p3787_p0 = pnand %p3785_p11, %p3749_p13  ;;  %p3794_p3 = por %p3793_p6, %p3792_p9 }
  0x24   : > { %p3788_p1 = pneg %p3787_p0 }
  0x26   : > { %p3795_p2 = pnand %p3794_p3, %p3788_p1 }
  0x28   : > { %3798 = shalt.err (!%p3795_p2)
}
  0x29   : > { %s3873_s26 = smov 64   ;;  %s3874_s28 = smov 4  }
  0x2a   : > { %3529 = dma.hbm_to_vmem [thread:$0]  (!%p3972_p12), %s4293_s4, 15360, %s217_s14, [#allocation9], %s3873_s26, %s3873_s26, %s3874_s28  }
  0x2b   : > { %251 = sbr.rel (%p3964_p10) target bundleno = 822 (0x336), region = 44  ;;  %p4301_p4 = scmp.eq.s32.totalorder (!%p3964_p10), %s3936_s25, 0 }
  0x30   : > { %3842 = dma.done.wait (%p4301_p4), [#allocation6], 3840   ;;  %p4302_p13 = pmov %p4301_p4 }
  0x31   : > { %p4303_p6 = pmov %p4301_p4 }
  0x32   : > { %3844 = vsyncadd (%p4302_p13), [#allocation6], 4294963456 }
  0x33   : > { %3846 = dma.done.wait (%p4303_p6), [#allocation9], 15360   ;;  %p4304_p9 = pmov %p4301_p4 }
  0x34   : > { %p290_p7 = scmp.lt.s32.totalorder %s3936_s25, 1  ;;  %v303_v0 = vlaneseq  ;;  %vm325_vm0 = vcmask 257027   ;;  %v3875_v1 = vmov 0   ;;  %v3876_v6 = vmov 0.0   ;;  %v3583_v10 = vld [vmem:[#allocation5 + $0x1c] ss:$12 sps:$4 sm:$0xff]  }
  0x35   : > { %3848 = vsyncadd (%p4304_p9), [#allocation9], 4294951936  ;;  %3581 = vset.pattern.permute.xlu0 %v3875_v1  ;;  %326 = vst.msk [vmem:[#allocation2] sm:$0x8] %vm325_vm0, %v3875_v1  ;;  %471 = vmatprep.mubr.bf16.mxu0 %v3875_v1  ;;  %v3585_v11 = vld [vmem:[#allocation5 + $0x18] ss:$12 sps:$4 sm:$0xff]  }
  0x36   : > { %s4009_s9 = scalar_select %p290_p7, %s3936_s25, 1  ;;  %v4011_v2 = vshrl.u32 %v303_v0, 7  ;;  %v3586_v12 = vld [vmem:[#allocation5 + $0x20] ss:$12 sps:$4 sm:$0xff]   ;;  %451 = vmatprep.subr.bf16.mxu0 %v3583_v10  ;;  %v3587_v13 = vld [vmem:[#allocation5 + $0x4] ss:$12 sps:$4 sm:$0xff]  }
  0x37   : > { %452 = vmatpush1.bf16.msra.mxu0 %v3585_v11  ;;  %3373 = vmatprep.subr.bf16.mxu1 %v3586_v12  ;;  %v3589_v14 = vld [vmem:[#allocation5] ss:$12 sps:$4 sm:$0xff]   ;;  %v3590_v15 = vld [vmem:[#allocation5 + $0x8] ss:$12 sps:$4 sm:$0xff]   ;;  %v3591_v16 = vld [vmem:[#allocation5 + $0x50] ss:$12 sps:$4 sm:$0xff]  }
  0x38   : > { %s3157_s11 = sshll.u32 %s4009_s9, 4  ;;  %v305_v3 = vadd.s32 8, %v4011_v2  ;;  %vm312_vm1 = vcmp.gt.s32.totalorder %v4011_v2, 0  ;;  %3374 = vmatpush3.bf16.msra.mxu1 %v3586_v12  ;;  %453 = vmatprep.subr.bf16.mxu0 %v3587_v13  ;;  %v3594_v17 = vld [vmem:[#allocation5 + $0x4c] ss:$12 sps:$4 sm:$0xff]   ;;  %s3158_s15 = sshll.u32 %s4009_s9, 3 }
  0x39   : > { %s294_s14 = scalar_lea.vmem %s4289_s0, %s3157_s11  ;;  %3375 = vmatprep.subr.bf16.mxu1 %v3590_v15  ;;  %v3877_v18 = vmov 839922192   ;;  %v3878_v20 = vmov 1985246804   ;;  %s299_s18 = scalar_lea.vmem %s4290_s1, %s3158_s15  ;;  %vm354_vm11 = vcmask 257024   ;;  %vm356_vm12 = vcmask 253952  }
  0x3a   : > { %v301_v4 = vld [vmem:[%s294_s14] sm:$0xff]  ;;  %v302_v5 = vld [vmem:[%s294_s14 + $0x8] sm:$0x3]  ;;  %vm317_vm7 = vcmp.lt.s32.totalorder %v305_v3, 9  ;;  %v337_v19 = vunpack.c.l.s4 %v3877_v18  ;;  %v344_v21 = vunpack.c.l.s4 %v3878_v20  ;;  %vm432_vm13 = vcmask 261120   ;;  %v3633_v10 = vld [vmem:[#allocation8 + $0x60] sm:$0xff]  }
  0x3b   : > { %vm306_vm2 = vcmp.ne.s32.totalorder %v301_v4, 2  ;;  %vm307_vm3 = vcmp.ne.s32.totalorder %v302_v5, 2  ;;  %vm308_vm4 = vcmp.ne.s32.totalorder %v301_v4, 1  ;;  %vm309_vm5 = vcmp.ne.s32.totalorder %v302_v5, 1  ;;  %454 = vmatpush1.bf16.msra.mxu0 %v3589_v14  ;;  %v329_v26 = vld [vmem:[%s299_s18] sm:$0xf] }
  0x3c   : > { %vm310_vm6 = vmand %vm306_vm2, %vm308_vm4  ;;  %3376 = vmatpush3.bf16.msra.mxu1 %v3590_v15  ;;  %3381 = vmatprep.subr.bf16.mxu0 %v3591_v16  ;;  %v338_v22 = vunpack.c.0.s8 %v337_v19  ;;  %v345_v23 = vunpack.c.0.s8 %v344_v21  ;;  %v330_v27 = vld [vmem:[%s299_s18 + $0x4] sm:$0x1]  ;;  %v381_v33 = vld [vmem:[#allocation2] sm:$0xf]  ;;  %v362_v59 = vsub.s32 0, %v4011_v2  ;;  %v366_v62 = vsub.s32 1, %v4011_v2 }
  0x3d   : > { %vm311_vm8 = vmand %vm307_vm3, %vm309_vm5  ;;  %628 = vmatprep.subr.bf16.mxu1 %v3594_v17  ;;  %v3592_v36 = vld [vmem:[#allocation5 + $0x48] ss:$12 sps:$4 sm:$0xff]   ;;  %v3598_v39 = vld [vmem:[#allocation5 + $0x38] ss:$12 sps:$4 sm:$0xff]   ;;  %v370_v63 = vsub.s32 2, %v4011_v2  ;;  %vm1285_vm14 = vcmask 1043459  }
  0x3e   : > { %vm314_vm9 = vmand %vm310_vm6, %vm312_vm1  ;;  %v341_v24 = vsub.s32 %v338_v22, %v4011_v2  ;;  %v348_v25 = vsub.s32 %v345_v23, %v4011_v2  ;;  %v3597_v38 = vld [vmem:[#allocation5 + $0x34] ss:$12 sps:$4 sm:$0xff]   ;;  %v3595_v40 = vld [vmem:[#allocation5 + $0x30] ss:$12 sps:$4 sm:$0xff]   ;;  %vm1286_vm15 = vsmask.f32 7950 }
  0x3f   : > { %vm319_vm10 = vmand %vm311_vm8, %vm317_vm7  ;;  %v2968_v7 = vsel %vm314_vm9, 1.0, %v3876_v6  ;;  %v3602_v41 = vld [vmem:[#allocation5 + $0x7c] ss:$12 sps:$4 sm:$0xff]   ;;  %v3599_v42 = vld [vmem:[#allocation5 + $0x80] ss:$12 sps:$4 sm:$0xff]   ;;  %vm1288_vm1 = vcmask 1047559  }
  0x40   : > { %v2969_v8 = vsel %vm319_vm10, 1.0, %v3876_v6  ;;  %v3606_v43 = vld [vmem:[#allocation5 + $0x68] ss:$12 sps:$4 sm:$0xff]   ;;  %v3610_v44 = vld [vmem:[#allocation5 + $0xac] ss:$12 sps:$4 sm:$0xff]   ;;  %v3627_v5 = vld [vmem:[#allocation8 + $0x70] sm:$0xff]  }
  0x41   : > { %v324_v9 = vpack.c.bf16 %v2969_v8, %v2968_v7  ;;  %v3600_v45 = vld [vmem:[#allocation5 + $0x78] ss:$12 sps:$4 sm:$0xff]   ;;  %v3603_v47 = vld [vmem:[#allocation5 + $0x60] ss:$12 sps:$4 sm:$0xff]   ;;  %v3607_v48 = vld [vmem:[#allocation5 + $0xb0] ss:$12 sps:$4 sm:$0xff]  }
  0x42   : > { %v3605_v46 = vld [vmem:[#allocation5 + $0x64] ss:$12 sps:$4 sm:$0xff]   ;;  %v3608_v49 = vld [vmem:[#allocation5 + $0xa8] ss:$12 sps:$4 sm:$0xff]   ;;  %v3618_v54 = vld [vmem:[#allocation5 + $0xe0] ss:$12 sps:$4 sm:$0xff]  }
  0x43   : > { %333 = vperm.xlu0 %3581, %v324_v9   ;;  %v3613_v50 = vld [vmem:[#allocation5 + $0x94] ss:$12 sps:$4 sm:$0xff]   ;;  %v3614_v51 = vld [vmem:[#allocation5 + $0x98] ss:$12 sps:$4 sm:$0xff]   ;;  %v3611_v52 = vld [vmem:[#allocation5 + $0x90] ss:$12 sps:$4 sm:$0xff]  }
  0x44   : > { %v3617_v53 = vld [vmem:[#allocation5 + $0xdc] ss:$12 sps:$4 sm:$0xff]   ;;  %v3615_v56 = vld [vmem:[#allocation5 + $0xd8] ss:$12 sps:$4 sm:$0xff]   ;;  %v3619_v58 = vld [vmem:[#allocation5 + $0xc0] ss:$12 sps:$4 sm:$0xff]  }
  0x45   : > { %v3622_v55 = vld [vmem:[#allocation5 + $0xc8] ss:$12 sps:$4 sm:$0xff]   ;;  %v3621_v57 = vld [vmem:[#allocation5 + $0xc4] ss:$12 sps:$4 sm:$0xff]   ;;  %v358_v60 = vld [vmem:[%s4292_s3] sm:$0x7] }
  0x46   : > { %v4082_v61 = vrot.slane %v358_v60, %v362_v59  ;;  %v4087_v0 = vrot.slane %v358_v60, %v366_v62  ;;  %v3624_v3 = vld [vmem:[#allocation8 + $0x78] sm:$0xff]   ;;  %v3628_v6 = vld [vmem:[#allocation8 + $0x30] sm:$0xff]   ;;  %v3630_v2 = vld [vmem:[#allocation8 + $0x68] sm:$0xff]   ;;  %vm1289_vm2 = vsmask.f32 7966  ;;  %vm1298_vm5 = vcmask 1041409  }
  0x47   : > { %v3625_v4 = vld [vmem:[#allocation8 + $0x38] sm:$0xff]   ;;  %v3631_v8 = vld [vmem:[#allocation8 + $0x28] sm:$0xff]   ;;  %v3626_v9 = vld [vmem:[#allocation8 + $0xb0] sm:$0xff]   ;;  %vm1299_vm6 = vsmask.f32 1280  ;;  %vm1301_vm8 = vcmask 1045509  }
  0x48   : > { %378 = vst [vmem:[#allocation4] sm:$0x3] %v4082_v61  ;;  %379 = vst [vmem:[#allocation4 + $0x18] sm:$0x3] %v4087_v0  ;;  %v3623_v7 = vld [vmem:[#allocation8 + $0xb8] sm:$0xff]   ;;  %v3634_v11 = vld [vmem:[#allocation8 + $0x20] sm:$0xff]  }
  0x49   : > { %v3629_v12 = vld [vmem:[#allocation8 + $0xa8] sm:$0xff]   ;;  %v3636_v13 = vld [vmem:[#allocation8 + $0x58] sm:$0xff]   ;;  %v3632_v15 = vld [vmem:[#allocation8 + $0xa0] sm:$0xff]   ;;  %vm1302_vm9 = vsmask.f32 5376  ;;  %s287_s29 = sand.u32 1, %s3859_s22  }
  0x4a   : > { %v3637_v14 = vld [vmem:[#allocation8 + $0x18] sm:$0xff]   ;;  %v3640_v17 = vld [vmem:[#allocation8 + $0x10] sm:$0xff]   ;;  %vm4093_vm0 = vmand %vm1285_vm14, %vm1286_vm15  ;;  %vm1068_vm14 = vcmask 1046528   ;;  %vm1245_vm15 = vcmask 1045504   ;;  %s2963_s10 = sshll.u32 %s287_s29, 3  ;;  %s3154_s9 = sshll.u32 %s3936_s25, 7 }
  0x4b   : > { %vm1290_vm3 = vmand %vm1288_vm1, %vm1289_vm2  ;;  %v1292_v19 = vld [vmem:[#allocation3] sm:$0x88]  ;;  %v3642_v21 = vld [vmem:[#allocation8 + $0x48] sm:$0xff]   ;;  %s289_s11 = scalar_lea.vmem [#allocation10], %s2963_s10  ;;  %s2860_s15 = scalar_lea.hbm %s4295_s6, %s3154_s9 }
  0x4c   : > { %vm1291_vm4 = vmor %vm1290_vm3, %vm4093_vm0  ;;  %v3635_v20 = vld [vmem:[#allocation8 + $0x98] sm:$0xff]   ;;  %v3643_v23 = vld [vmem:[#allocation8 + $0x8] sm:$0xff]   ;;  %s2862_s12 = sshll.u32 %s289_s11, 4  ;;  %s2849_s16 = scalar_lea.sflag [#allocation7], %s287_s29  ;;  %s2863_s12 = int_to_ptr.vmem [resolvable:$true] %s2862_s12 }
  0x4d   : > { %v1293_v22 = vsel %vm1291_vm4, 0, %v1292_v19  ;;  %vm4101_vm7 = vmand %vm1298_vm5, %vm1299_vm6  ;;  %s3799_s17 = scalar_lea.vmem %s2863_s12, 128  ;;  %s3879_s18 = smov [#allocation10]  }
  0x4e   : > { %1294 = vst [vmem:[#allocation3] sm:$0x88] %v1293_v22  ;;  %vm1303_vm10 = vmand %vm1301_vm8, %vm1302_vm9  ;;  %p3800_p10 = scmp.ne.s32.totalorder %s2863_s12, %s3799_s17  ;;  %s3803_s25 = sshll.u32 %s3879_s18, 4  ;;  %s3804_s25 = int_to_ptr.vmem [resolvable:$false] %s3803_s25 }
  0x4f   : > { %s3805_s19 = scalar_lea.vmem %s3804_s25, 256  ;;  %p3806_p11 = scmp.lt.s32.totalorder %s2863_s12, %s3804_s25 }
  0x50   : > { %p3801_p12 = pnand %p3800_p10, %p3953_p5  ;;  %p3807_p0 = scmp.lt.s32.totalorder %s3805_s19, %s3799_s17 }
  0x52   : > { %p3802_p8 = pneg %p3801_p12  ;;  %p3808_p1 = por %p3807_p0, %p3806_p11 }
  0x54   : > { %p3809_p3 = pnand %p3808_p1, %p3802_p8 }
  0xbe   : > { %v334_v28 = vpop.permute.xlu0 %333 }
  0xbf   : > { %v342_v29 = vrot.slane %v334_v28, %v341_v24  ;;  %v349_v30 = vrot.slane %v334_v28, %v348_v25  ;;  %v1295_v24 = vld [vmem:[#allocation3 + $0x8] sm:$0x8]  ;;  %v3638_v25 = vld [vmem:[#allocation8 + $0x90] sm:$0xff]  }
  0xc0   : > { %v3646_v28 = vld [vmem:[#allocation8] sm:$0xff]  }
  0xc1   : > { %v352_v31 = vmul.bf16 %v342_v29, %v329_v26  ;;  %v353_v32 = vmul.bf16 %v349_v30, %v330_v27  ;;  %v3645_v26 = vld [vmem:[#allocation8 + $0x40] sm:$0xff]   ;;  %v1296_v27 = vsel %vm4093_vm0, 0, %v1295_v24  ;;  %v3641_v29 = vld [vmem:[#allocation8 + $0x88] sm:$0xff]   ;;  %vm2841_vm0 = vcmask 1044480  }
  0xc2   : > { %1297 = vst [vmem:[#allocation3 + $0x8] sm:$0x8] %v1296_v27  ;;  %v3644_v30 = vld [vmem:[#allocation8 + $0x80] sm:$0xff]  }
  0xc3   : > { %355 = vst.msk [vmem:[#allocation2 + $0x4] sm:$0xf] %vm354_vm11, %v352_v31  ;;  %vm1304_vm11 = vmor %vm1303_vm10, %vm4101_vm7 }
  0xc4   : > { %357 = vst.msk [vmem:[#allocation2 + $0x8] sm:$0x1] %vm356_vm12, %v353_v32  ;;  %v1308_v32 = vld [vmem:[#allocation3 + $0x20] sm:$0x2]  ;;  %vm730_vm12 = vcmask 1040384  }
  0xca   : > { %v382_v34 = vld [vmem:[#allocation2 + $0x4] sm:$0xf] }
  0xcb   : > { %v4025_v35 = vcombine.low %v381_v33, %v382_v34  ;;  %v4027_v37 = vld [vmem:[#allocation2 + $0x8] ss:$0 sps:$4 sm:$0xff]   ;;  %v1309_v34 = vsel %vm4101_vm7, 0, %v1308_v32 }
  0xcc   : > { %v3650_v33 = vld [vmem:[#allocation8 + $0x138] sm:$0xff]   ;;  %1310 = vst [vmem:[#allocation3 + $0x20] sm:$0x2] %v1309_v34 }
  0xcd   : > { %2978 = vmatmul.mubr.msk.bf16.vlgmr.msra.gmra.mxu0 %vm432_vm13, %v4025_v35  ;;  %3377 = vmatprep.mubr.msk.bf16.mxu1 %vm432_vm13, %v4025_v35 }
  0xce   : > { %3382 = vmatpush3.bf16.msra.mxu0 %v3591_v16  ;;  %3378 = vmatmul.mubr.msk.bf16.vlgmr.msra.gmra.mxu1 %vm432_vm13, %v4027_v37  ;;  %v3639_v16 = vld [vmem:[#allocation8 + $0x50] sm:$0xff]  }
  0xcf   : > { %629 = vmatpush1.bf16.msra.mxu1 %v3592_v36  ;;  %481 = vmatprep.mubr.bf16.mxu0 %v3875_v1  ;;  %v1305_v36 = vld [vmem:[#allocation3 + $0x18] sm:$0x22] }
  0xd0   : > { %630 = vmatprep.subr.bf16.mxu1 %v3597_v38  ;;  %3383 = vmatprep.subr.bf16.mxu0 %v3598_v39 }
  0xd1   : > { %648 = vmatprep.mubr.bf16.mxu1 %v3875_v1 }
  0xd2   : > { %3384 = vmatpush3.bf16.msra.mxu0 %v3598_v39 }
  0xd3   : > { %631 = vmatpush1.bf16.msra.mxu1 %v3595_v40  ;;  %817 = vmatprep.subr.bf16.mxu0 %v3602_v41 }
  0xd4   : > { %3389 = vmatprep.subr.bf16.mxu1 %v3599_v42 }
  0xd5   : > { %2979 = vmatmul.mubr.msk.bf16.gmra.mxu0 %vm432_vm13, %v4027_v37 }
  0xd6   : > { %2988 = vmatmul.mubr.msk.bf16.vlgmr.msra.gmra.mxu1 %vm432_vm13, %v4025_v35  ;;  %3385 = vmatprep.mubr.msk.bf16.mxu0 %vm432_vm13, %v4025_v35 }
  0xd7   : > { %3390 = vmatpush3.bf16.msra.mxu1 %v3599_v42  ;;  %658 = vmatprep.mubr.bf16.mxu1 %v3875_v1 }
  0xd8   : > { %3391 = vmatprep.subr.bf16.mxu1 %v3606_v43 }
  0xdb   : > { %3392 = vmatpush3.bf16.msra.mxu1 %v3606_v43  ;;  %v538_v43 = vld [vmem:[#allocation4] sm:$0x3] }
  0xdc   : > { %972 = vmatprep.subr.bf16.mxu1 %v3610_v44 }
  0xdd   : > { %3386 = vmatmul.mubr.msk.bf16.vlgmr.msra.gmra.mxu0 %vm432_vm13, %v4027_v37 }
  0xde   : > { %818 = vmatpush1.bf16.msra.mxu0 %v3600_v45  ;;  %2989 = vmatmul.mubr.msk.bf16.gmra.mxu1 %vm432_vm13, %v4027_v37 }
  0xdf   : > { %3393 = vmatprep.mubr.msk.bf16.mxu1 %vm432_vm13, %v4025_v35  ;;  %819 = vmatprep.subr.bf16.mxu0 %v3605_v46 }
  0xe0   : > { %837 = vmatprep.mubr.bf16.mxu0 %v3875_v1 }
  0xe2   : > { %820 = vmatpush1.bf16.msra.mxu0 %v3603_v47  ;;  %v539_v47 = vld [vmem:[#allocation4 + $0x18] sm:$0x3] }
  0xe3   : > { %3397 = vmatprep.subr.bf16.mxu0 %v3607_v48 }
  0xe5   : > { %2998 = vmatmul.mubr.msk.bf16.vlgmr.msra.gmra.mxu0 %vm432_vm13, %v4025_v35 }
  0xe6   : > { %3398 = vmatpush3.bf16.msra.mxu0 %v3607_v48  ;;  %3394 = vmatmul.mubr.msk.bf16.vlgmr.msra.gmra.mxu1 %vm432_vm13, %v4027_v37 }
  0xe7   : > { %973 = vmatpush1.bf16.msra.mxu1 %v3608_v49  ;;  %845 = vmatprep.mubr.bf16.mxu0 %v3875_v1 }
  0xe8   : > { %974 = vmatprep.subr.bf16.mxu1 %v3613_v50  ;;  %3399 = vmatprep.subr.bf16.mxu0 %v3614_v51 }
  0xe9   : > { %992 = vmatprep.mubr.bf16.mxu1 %v3875_v1 }
  0xea   : > { %3400 = vmatpush3.bf16.msra.mxu0 %v3614_v51 }
  0xeb   : > { %975 = vmatpush1.bf16.msra.mxu1 %v3611_v52  ;;  %1149 = vmatprep.subr.bf16.mxu0 %v3617_v53 }
  0xec   : > { %3405 = vmatprep.subr.bf16.mxu1 %v3618_v54 }
  0xed   : > { %2999 = vmatmul.mubr.msk.bf16.gmra.mxu0 %vm432_vm13, %v4027_v37 }
  0xee   : > { %3008 = vmatmul.mubr.msk.bf16.vlgmr.msra.gmra.mxu1 %vm432_vm13, %v4025_v35  ;;  %3401 = vmatprep.mubr.msk.bf16.mxu0 %vm432_vm13, %v4025_v35 }
  0xef   : > { %1000 = vmatprep.mubr.bf16.mxu1 %v3875_v1  ;;  %3406 = vmatpush3.bf16.msra.mxu1 %v3618_v54 }
  0xf0   : > { %3407 = vmatprep.subr.bf16.mxu1 %v3622_v55 }
  0xf3   : > { %3408 = vmatpush3.bf16.msra.mxu1 %v3622_v55 }
  0xf4   : > { %3413 = vmatprep.subr.bf16.mxu1 %v3623_v7 }
  0xf5   : > { %3402 = vmatmul.mubr.msk.bf16.vlgmr.msra.gmra.mxu0 %vm432_vm13, %v4027_v37 }
  0xf6   : > { %1150 = vmatpush1.bf16.msra.mxu0 %v3615_v56  ;;  %3009 = vmatmul.mubr.msk.bf16.gmra.mxu1 %vm432_vm13, %v4027_v37 }
  0xf7   : > { %3409 = vmatprep.mubr.msk.bf16.mxu1 %vm432_vm13, %v4025_v35  ;;  %1151 = vmatprep.subr.bf16.mxu0 %v3621_v57 }
  0xf8   : > { %1169 = vmatprep.mubr.bf16.mxu0 %v3875_v1 }
  0xfa   : > { %1152 = vmatpush1.bf16.msra.mxu0 %v3619_v58 }
  0xfb   : > { %3183 = vmatprep.subr.bf16.mxu0 %v3624_v3 }
  0xfd   : > { %3018 = vmatmul.mubr.msk.bf16.vlgmr.msra.gmra.mxu0 %vm432_vm13, %v4025_v35  ;;  %v4107_v35 = vld [vmem:[#allocation8 + $0x178] sm:$0xff]  }
  0xfe   : > { %3410 = vmatmul.mubr.msk.bf16.vlgmr.msra.gmra.mxu1 %vm432_vm13, %v4027_v37  ;;  %1177 = vmatprep.mubr.bf16.mxu0 %v3875_v1  ;;  %v4089_v1 = vrot.slane %v358_v60, %v370_v63 }
  0xff   : > { %3184 = vmatpush3.bf16.msra.mxu0 %v3625_v4  ;;  %3414 = vmatpush3.bf16.msra.mxu1 %v3623_v7 }
 0x100   : > { %380 = vst [vmem:[#allocation4 + $0x20] sm:$0x3] %v4089_v1  ;;  %3185 = vmatprep.subr.bf16.mxu0 %v3627_v5  ;;  %3415 = vmatprep.subr.bf16.mxu1 %v3626_v9 }
 0x103   : > { %3186 = vmatpush3.bf16.msra.mxu0 %v3628_v6  ;;  %3416 = vmatpush3.bf16.msra.mxu1 %v3626_v9 }
 0x104   : > { %3187 = vmatprep.subr.bf16.mxu0 %v3630_v2  ;;  %3417 = vmatprep.subr.bf16.mxu1 %v3629_v12 }
 0x105   : > { %3019 = vmatmul.mubr.msk.bf16.gmra.mxu0 %vm432_vm13, %v4027_v37  ;;  %v1306_v37 = vsel %vm1304_vm11, 0, %v1305_v36  ;;  %vm547_vm13 = vcmask 1041408  }
 0x106   : > { %1307 = vst [vmem:[#allocation3 + $0x18] sm:$0x22] %v1306_v37 }
 0x107   : > { %3188 = vmatpush3.bf16.msra.mxu0 %v3631_v8  ;;  %3418 = vmatpush3.bf16.msra.mxu1 %v3629_v12  ;;  %v540_v51 = vld [vmem:[#allocation4 + $0x20] sm:$0x3] }
 0x108   : > { %3189 = vmatprep.subr.bf16.mxu0 %v3633_v10  ;;  %3419 = vmatprep.subr.bf16.mxu1 %v3632_v15 }
 0x10b   : > { %3190 = vmatpush3.bf16.msra.mxu0 %v3634_v11  ;;  %3420 = vmatpush3.bf16.msra.mxu1 %v3632_v15 }
 0x10c   : > { %3191 = vmatprep.subr.bf16.mxu0 %v3636_v13  ;;  %3421 = vmatprep.subr.bf16.mxu1 %v3635_v20 }
 0x10f   : > { %3192 = vmatpush3.bf16.msra.mxu0 %v3637_v14  ;;  %3422 = vmatpush3.bf16.msra.mxu1 %v3635_v20 }
 0x110   : > { %3193 = vmatprep.subr.bf16.mxu0 %v3639_v16  ;;  %3423 = vmatprep.subr.bf16.mxu1 %v3638_v25 }
 0x113   : > { %3194 = vmatpush3.bf16.msra.mxu0 %v3640_v17  ;;  %3424 = vmatpush3.bf16.msra.mxu1 %v3638_v25 }
 0x114   : > { %3195 = vmatprep.subr.bf16.mxu0 %v3642_v21  ;;  %3425 = vmatprep.subr.bf16.mxu1 %v3641_v29 }
 0x117   : > { %3196 = vmatpush3.bf16.msra.mxu0 %v3643_v23  ;;  %3426 = vmatpush3.bf16.msra.mxu1 %v3641_v29 }
 0x118   : > { %3197 = vmatprep.subr.bf16.mxu0 %v3645_v26  ;;  %3427 = vmatprep.subr.bf16.mxu1 %v3644_v30 }
 0x11b   : > { %3198 = vmatpush3.bf16.msra.mxu0 %v3646_v28  ;;  %3428 = vmatpush3.bf16.msra.mxu1 %v3644_v30 }
 0x11c   : > { %3221 = vmatprep.subr.bf16.mxu0 %v3650_v33  ;;  %3433 = vmatprep.subr.bf16.mxu1 %v4107_v35 }
 0x18d   : > { %v4112_v38 = vpop.f32.mrf.mxu0 }
 0x18e   : > { %v3379_v39 = vpop.f32.mrf.mxu1 }
 0x18f   : > { %v4114_v40 = vpop.f32.mrf.mxu0 }
 0x190   : > { %v4116_v41 = vpop.f32.mrf.mxu1 }
 0x191   : > { %v4118_v42 = vpop.f32.mrf.mxu0 }
 0x192   : > { %v549_v44 = vrot.slane %v4118_v42, 6  ;;  %v3380_v45 = vpop.f32.mrf.mxu1 }
 0x193   : > { %v4121_v46 = vpop.f32.mrf.mxu0 }
 0x194   : > { %v566_v48 = vadd.f32 %v549_v44, %v538_v43  ;;  %v552_v49 = vrot.slane %v4121_v46, 6  ;;  %v4126_v50 = vpop.f32.mrf.mxu1 }
 0x195   : > { %v555_v52 = vrot.slane %v4126_v50, 6  ;;  %v483_v53 = vpop.f32.mrf.mxu0 }
 0x196   : > { %572 = vst [vmem:[#allocation4] sm:$0x3] %v566_v48  ;;  %v567_v54 = vadd.f32 %v552_v49, %v539_v47  ;;  %v4131_v55 = vpop.f32.mrf.mxu1 }
 0x197   : > { %v568_v56 = vadd.f32 %v555_v52, %v540_v51  ;;  %v484_v57 = vpop.f32.mrf.mxu0 }
 0x198   : > { %573 = vst [vmem:[#allocation4 + $0x18] sm:$0x3] %v567_v54  ;;  %v4135_v58 = vpop.f32.mrf.mxu1 }
 0x199   : > { %574 = vst [vmem:[#allocation4 + $0x20] sm:$0x3] %v568_v56  ;;  %v485_v59 = vpop.f32.mrf.mxu0 }
 0x19a   : > { %v4137_v60 = vpop.f32.mrf.mxu1 }
 0x19b   : > { %v486_v62 = vpop.f32.mrf.mxu0  ;;  %v732_v5 = vrot.slane %v4137_v60, 7 }
 0x19c   : > { %v4139_v63 = vpop.f32.mrf.mxu1 }
 0x19d   : > { %v3387_v3 = vpop.f32.mrf.mxu0  ;;  %v735_v8 = vrot.slane %v4139_v63, 7  ;;  %v718_v9 = vld [vmem:[#allocation4] sm:$0x3] }
 0x19e   : > { %v660_v4 = vpop.f32.mrf.mxu1  ;;  %v744_v18 = vrot.slane %v3387_v3, 7 }
 0x19f   : > { %v740_v6 = vrot.slane %v660_v4, 7  ;;  %v4142_v7 = vpop.f32.mrf.mxu0  ;;  %v719_v15 = vld [vmem:[#allocation4 + $0x18] sm:$0x3] }
 0x1a0   : > { %v662_v2 = vpop.f32.mrf.mxu1  ;;  %v720_v23 = vld [vmem:[#allocation4 + $0x20] sm:$0x3] }
 0x1a1   : > { %v741_v10 = vsel %vm730_vm12, %v732_v5, %v740_v6  ;;  %v742_v11 = vrot.slane %v662_v2, 7  ;;  %v3388_v12 = vpop.f32.mrf.mxu0 }
 0x1a2   : > { %v755_v13 = vadd.f32 %v741_v10, %v718_v9  ;;  %v664_v14 = vpop.f32.mrf.mxu1 }
 0x1a3   : > { %v743_v16 = vsel %vm730_vm12, %v735_v8, %v742_v11  ;;  %v4151_v17 = vpop.f32.mrf.mxu0 }
 0x1a4   : > { %761 = vst [vmem:[#allocation4] sm:$0x3] %v755_v13  ;;  %v756_v19 = vadd.f32 %v743_v16, %v719_v15  ;;  %v738_v20 = vrot.slane %v4151_v17, 7  ;;  %v665_v21 = vpop.f32.mrf.mxu1  ;;  %v554_v16 = vrot.slane %v4116_v41, 6 }
 0x1a5   : > { %v839_v22 = vpop.f32.mrf.mxu0 }
 0x1a6   : > { %762 = vst [vmem:[#allocation4 + $0x18] sm:$0x3] %v756_v19  ;;  %v745_v24 = vsel %vm730_vm12, %v738_v20, %v744_v18  ;;  %v3395_v25 = vpop.f32.mrf.mxu1  ;;  %v548_v22 = vrot.slane %v4112_v38, 6 }
 0x1a7   : > { %v757_v26 = vadd.f32 %v745_v24, %v720_v23  ;;  %v840_v27 = vpop.f32.mrf.mxu0  ;;  %v556_v24 = vsel %vm547_vm13, %v554_v16, %v555_v52 }
 0x1a8   : > { %v888_v28 = vpop.f32.mrf.mxu1  ;;  %v551_v27 = vrot.slane %v4114_v40, 6  ;;  %v550_v41 = vsel %vm547_vm13, %v548_v22, %v549_v44  ;;  %v734_v40 = vrot.slane %v4135_v58, 7 }
 0x1a9   : > { %763 = vst [vmem:[#allocation4 + $0x20] sm:$0x3] %v757_v26  ;;  %v4157_v29 = vpop.f32.mrf.mxu0  ;;  %v731_v28 = vrot.slane %v4131_v55, 7  ;;  %v563_v55 = vadd.f32 %v550_v41, %v4082_v61 }
 0x1aa   : > { %v3396_v30 = vpop.f32.mrf.mxu1 }
 0x1ab   : > { %v4159_v31 = vpop.f32.mrf.mxu0  ;;  %v904_v34 = vld [vmem:[#allocation4] sm:$0x3]  ;;  %v733_v42 = vsel %vm730_vm12, %v731_v28, %v732_v5 }
 0x1ac   : > { %v4161_v32 = vpop.f32.mrf.mxu1 }
 0x1ad   : > { %v847_v33 = vpop.f32.mrf.mxu0  ;;  %v905_v43 = vld [vmem:[#allocation4 + $0x18] sm:$0x3] }
 0x1ae   : > { %v910_v36 = vadd.f32 %v904_v34, %v847_v33  ;;  %v994_v37 = vpop.f32.mrf.mxu1  ;;  %v565_v33 = vadd.f32 %v556_v24, %v4089_v1  ;;  %v1343_v24 = vld [vmem:[#allocation3] sm:$0xff] }
 0x1af   : > { %v849_v39 = vpop.f32.mrf.mxu0 }
 0x1b0   : > { %v906_v45 = vld [vmem:[#allocation4 + $0x20] sm:$0x3]  ;;  %916 = vst [vmem:[#allocation4] sm:$0x3] %v910_v36  ;;  %v911_v47 = vadd.f32 %v905_v43, %v849_v39  ;;  %v995_v48 = vpop.f32.mrf.mxu1  ;;  %v752_v36 = vadd.f32 %v733_v42, %v563_v55  ;;  %v3655_v42 = vld [vmem:[#allocation8 + $0xf0] sm:$0xff]   ;;  %v3657_v55 = vld [vmem:[#allocation8 + $0x128] sm:$0xff]  }
 0x1b1   : > { %v912_v51 = vadd.f32 %v3395_v25, %v906_v45  ;;  %v851_v53 = vpop.f32.mrf.mxu0  ;;  %v737_v25 = vrot.slane %v4142_v7, 7  ;;  %v553_v7 = vsel %vm547_vm13, %v551_v27, %v552_v49 }
 0x1b2   : > { %917 = vst [vmem:[#allocation4 + $0x18] sm:$0x3] %v911_v47  ;;  %v996_v54 = vpop.f32.mrf.mxu1  ;;  %v564_v1 = vadd.f32 %v553_v7, %v4087_v0  ;;  %v907_v45 = vadd.f32 %v4157_v29, %v752_v36 }
 0x1b3   : > { %918 = vst [vmem:[#allocation4 + $0x20] sm:$0x3] %v912_v51  ;;  %v852_v56 = vpop.f32.mrf.mxu0  ;;  %v739_v38 = vsel %vm730_vm12, %v737_v25, %v738_v20  ;;  %v736_v20 = vsel %vm730_vm12, %v734_v40, %v735_v8  ;;  %v1069_v34 = vrot.slane %v996_v54, 1 }
 0x1b4   : > { %v4163_v57 = vpop.f32.mrf.mxu1  ;;  %v754_v46 = vadd.f32 %v739_v38, %v565_v33  ;;  %v753_v8 = vadd.f32 %v736_v20, %v564_v1 }
 0x1b5   : > { %v3403_v59 = vpop.f32.mrf.mxu0  ;;  %v1072_v61 = vrot.slane %v4163_v57, 1 }
 0x1b6   : > { %v1002_v62 = vpop.f32.mrf.mxu1  ;;  %v1076_v9 = vrot.slane %v3403_v59, 1  ;;  %v909_v5 = vadd.f32 %v4161_v32, %v754_v46  ;;  %v908_v32 = vadd.f32 %v4159_v31, %v753_v8  ;;  %v3653_v46 = vld [vmem:[#allocation8 + $0x170] sm:$0xff]  }
 0x1b7   : > { %v1059_v3 = vld [vmem:[#allocation4] sm:$0x3]  ;;  %v1070_v4 = vrot.slane %v1002_v62, 1  ;;  %v1043_v6 = vpop.f32.mrf.mxu0  ;;  %v3666_v8 = vld [vmem:[#allocation8 + $0x150] sm:$0xff]  }
 0x1b8   : > { %v1004_v2 = vpop.f32.mrf.mxu1 }
 0x1b9   : > { %v1087_v10 = vadd.f32 %v1070_v4, %v1059_v3  ;;  %v1060_v11 = vld [vmem:[#allocation4 + $0x18] sm:$0x3]  ;;  %v1073_v12 = vrot.slane %v1004_v2, 1  ;;  %v3404_v13 = vpop.f32.mrf.mxu0  ;;  %v1071_v39 = vsel %vm1068_vm14, %v1069_v34, %v1070_v4  ;;  %v3661_v34 = vld [vmem:[#allocation8 + $0x120] sm:$0xff]  }
 0x1ba   : > { %v1061_v14 = vld [vmem:[#allocation4 + $0x20] sm:$0x3]  ;;  %v1006_v15 = vpop.f32.mrf.mxu1  ;;  %v1084_v59 = vadd.f32 %v1071_v39, %v907_v45  ;;  %v3663_v39 = vld [vmem:[#allocation8 + $0x158] sm:$0xff]   ;;  %v3671_v45 = vld [vmem:[#allocation8 + $0xc8] sm:$0xff]  }
 0x1bb   : > { %v1089_v18 = vadd.f32 %v1076_v9, %v1061_v14  ;;  %1093 = vst [vmem:[#allocation4] sm:$0x3] %v1087_v10  ;;  %v1088_v19 = vadd.f32 %v1073_v12, %v1060_v11  ;;  %v1045_v21 = vpop.f32.mrf.mxu0  ;;  %v1074_v51 = vsel %vm1068_vm14, %v1072_v61, %v1073_v12  ;;  %v3667_v61 = vld [vmem:[#allocation8 + $0x110] sm:$0xff]  }
 0x1bc   : > { %v1007_v23 = vpop.f32.mrf.mxu1  ;;  %v1075_v50 = vrot.slane %v1045_v21, 1  ;;  %v1085_v10 = vadd.f32 %v1074_v51, %v908_v32  ;;  %v3676_v51 = vld [vmem:[#allocation8 + $0x1f8] sm:$0xff]  }
 0x1bd   : > { %1095 = vst [vmem:[#allocation4 + $0x20] sm:$0x3] %v1089_v18  ;;  %1094 = vst [vmem:[#allocation4 + $0x18] sm:$0x3] %v1088_v19  ;;  %v1171_v26 = vpop.f32.mrf.mxu0  ;;  %v3675_v32 = vld [vmem:[#allocation8 + $0x238] sm:$0xff]  }
 0x1be   : > { %v3411_v30 = vpop.f32.mrf.mxu1  ;;  %v1077_v58 = vsel %vm1068_vm14, %v1075_v50, %v1076_v9  ;;  %v3654_v50 = vld [vmem:[#allocation8 + $0x130] sm:$0xff]  }
 0x1bf   : > { %v1172_v52 = vpop.f32.mrf.mxu0  ;;  %v1253_v60 = vrot.slane %v3411_v30, 2  ;;  %v1086_v53 = vadd.f32 %v1077_v58, %v909_v5  ;;  %v3651_v30 = vld [vmem:[#allocation8 + $0xf8] sm:$0xff]   ;;  %v3660_v5 = vld [vmem:[#allocation8 + $0x160] sm:$0xff]  }
 0x1c0   : > { %v1220_v44 = vpop.f32.mrf.mxu1 }
 0x1c1   : > { %v1173_v17 = vpop.f32.mrf.mxu0 }
 0x1c2   : > { %v3412_v49 = vpop.f32.mrf.mxu1  ;;  %v1246_v54 = vrot.slane %v1173_v17, 2  ;;  %v1236_v3 = vld [vmem:[#allocation4] sm:$0x3]  ;;  %v3659_v17 = vld [vmem:[#allocation8 + $0xe8] sm:$0xff]  }
 0x1c3   : > { %v1175_v37 = vpop.f32.mrf.mxu0  ;;  %v3656_v49 = vld [vmem:[#allocation8 + $0x168] sm:$0xff]  }
 0x1c4   : > { %v1238_v43 = vld [vmem:[#allocation4 + $0x20] sm:$0x3]  ;;  %v1222_v63 = vpop.f32.mrf.mxu1  ;;  %v1249_v57 = vrot.slane %v1175_v37, 2  ;;  %v1237_v12 = vld [vmem:[#allocation4 + $0x18] sm:$0x3] }
 0x1c5   : > { %v1266_v47 = vadd.f32 %v1253_v60, %v1238_v43  ;;  %v1252_v48 = vrot.slane %v1222_v63, 2  ;;  %v1179_v0 = vpop.f32.mrf.mxu0  ;;  %v3664_v37 = vld [vmem:[#allocation8 + $0x118] sm:$0xff]   ;;  %v3668_v43 = vld [vmem:[#allocation8 + $0xd0] sm:$0xff]   ;;  %v3670_v63 = vld [vmem:[#allocation8 + $0x108] sm:$0xff]  }
 0x1c6   : > { %v1247_v56 = vrot.slane %v1179_v0, 2  ;;  %v3674_v0 = vld [vmem:[#allocation8 + $0xc0] sm:$0xff]  }
 0x1c7   : > { %1272 = vst [vmem:[#allocation4 + $0x20] sm:$0x3] %v1266_v47  ;;  %v1254_v62 = vsel %vm1245_vm15, %v1252_v48, %v1253_v60  ;;  %v1181_v4 = vpop.f32.mrf.mxu0  ;;  %v3662_v60 = vld [vmem:[#allocation8 + $0xe0] sm:$0xff]   ;;  %v3669_v48 = vld [vmem:[#allocation8 + $0x148] sm:$0xff]  }
 0x1c8   : > { %v1263_v6 = vadd.f32 %v1254_v62, %v1086_v53  ;;  %v1248_v29 = vsel %vm1245_vm15, %v1246_v54, %v1247_v56  ;;  %v1264_v2 = vadd.f32 %v1247_v56, %v1236_v3  ;;  %v1250_v9 = vrot.slane %v1181_v4, 2  ;;  %v3673_v47 = vld [vmem:[#allocation8 + $0x100] sm:$0xff]   ;;  %v3677_v54 = vld [vmem:[#allocation8 + $0x1b8] sm:$0xff]   ;;  %v3679_v56 = vld [vmem:[#allocation8 + $0x1f0] sm:$0xff]  }
 0x1c9   : > { %v1261_v11 = vadd.f32 %v1248_v29, %v1084_v59  ;;  %v1183_v13 = vpop.f32.mrf.mxu0  ;;  %v3672_v53 = vld [vmem:[#allocation8 + $0x140] sm:$0xff]   ;;  %v3680_v59 = vld [vmem:[#allocation8 + $0x1b0] sm:$0xff]   ;;  %v3682_v62 = vld [vmem:[#allocation8 + $0x1e8] sm:$0xff]  }
 0x1ca   : > { %v1281_v14 = vmax.f32 %v1263_v6, 0.0  ;;  %1270 = vst [vmem:[#allocation4] sm:$0x3] %v1264_v2  ;;  %v1251_v31 = vsel %vm1245_vm15, %v1249_v57, %v1250_v9  ;;  %v1265_v15 = vadd.f32 %v1250_v9, %v1237_v12  ;;  %v3678_v57 = vld [vmem:[#allocation8 + $0x230] sm:$0xff]   ;;  %v3683_v3 = vld [vmem:[#allocation8 + $0x1a8] sm:$0xff]   ;;  %v3685_v4 = vld [vmem:[#allocation8 + $0x1e0] sm:$0xff]  }
 0x1cb   : > { %v1262_v16 = vadd.f32 %v1251_v31, %v1085_v10  ;;  %v1184_v18 = vpop.f32.mrf.mxu0  ;;  %v1279_v21 = vmax.f32 %v1261_v11, 0.0  ;;  %v3681_v6 = vld [vmem:[#allocation8 + $0x228] sm:$0xff]   ;;  %v3686_v29 = vld [vmem:[#allocation8 + $0x1a0] sm:$0xff]   ;;  %v3688_v2 = vld [vmem:[#allocation8 + $0x1d8] sm:$0xff]  }
 0x1cc   : > { %v3160_v19 = vpack.c.bf16 %v1281_v14, %v1281_v14  ;;  %1271 = vst [vmem:[#allocation4 + $0x18] sm:$0x3] %v1265_v15  ;;  %v3684_v9 = vld [vmem:[#allocation8 + $0x220] sm:$0xff]   ;;  %v3689_v10 = vld [vmem:[#allocation8 + $0x198] sm:$0xff]   ;;  %v3691_v11 = vld [vmem:[#allocation8 + $0x1d0] sm:$0xff]  }
 0x1cd   : > { %v1280_v22 = vmax.f32 %v1262_v16, 0.0  ;;  %v3687_v12 = vld [vmem:[#allocation8 + $0x218] sm:$0xff]   ;;  %v3692_v13 = vld [vmem:[#allocation8 + $0x190] sm:$0xff]   ;;  %v3694_v14 = vld [vmem:[#allocation8 + $0x1c8] sm:$0xff]  }
 0x1ce   : > { %1332 = vst [vmem:[#allocation3 + $0x14] sm:$0xf] %v3160_v19  ;;  %v1278_v23 = vld [vmem:[#allocation4 + $0x20] sm:$0x3]  ;;  %v3690_v31 = vld [vmem:[#allocation8 + $0x210] sm:$0xff]   ;;  %v3695_v15 = vld [vmem:[#allocation8 + $0x188] sm:$0xff]  }
 0x1cf   : > { %v3159_v25 = vpack.c.bf16 %v1280_v22, %v1279_v21  ;;  %v1284_v26 = vmax.f32 %v1278_v23, 0.0  ;;  %v3697_v16 = vld [vmem:[#allocation8 + $0x1c0] sm:$0xff]   ;;  %v3693_v18 = vld [vmem:[#allocation8 + $0x208] sm:$0xff]   ;;  %v3700_v21 = vld [vmem:[#allocation8 + $0x2b8] sm:$0xff]  }
 0x1d0   : > { %v3698_v19 = vld [vmem:[#allocation8 + $0x180] sm:$0xff]   ;;  %v3701_v23 = vld [vmem:[#allocation8 + $0x278] sm:$0xff]  }
 0x1d1   : > { %v3162_v27 = vpack.c.bf16 %v1284_v26, %v1284_v26  ;;  %v4202_v41 = vcombine.high %v1343_v24, %v3159_v25  ;;  %v4204_v28 = vcombine.low %v1343_v24, %v3159_v25  ;;  %v1276_v38 = vld [vmem:[#allocation4] sm:$0x3]  ;;  %v3703_v24 = vld [vmem:[#allocation8 + $0x2b0] sm:$0xff]   ;;  %v3699_v25 = vld [vmem:[#allocation8 + $0x2f8] sm:$0xff]  }
 0x1d2   : > { %v1282_v7 = vmax.f32 %v1276_v38, 0.0  ;;  %v3696_v22 = vld [vmem:[#allocation8 + $0x200] sm:$0xff]   ;;  %v3704_v26 = vld [vmem:[#allocation8 + $0x270] sm:$0xff]   ;;  %v3707_v38 = vld [vmem:[#allocation8 + $0x268] sm:$0xff]  }
 0x1d3   : > { %1334 = vst [vmem:[#allocation3 + $0x20] sm:$0x1] %v3162_v27  ;;  %1600 = vmatprep.mubr.bf16.mxu0 %v4202_v41  ;;  %v1277_v52 = vld [vmem:[#allocation4 + $0x18] sm:$0x3]  ;;  %v3702_v27 = vld [vmem:[#allocation8 + $0x2f0] sm:$0xff]  }
 0x1d4   : > { %1601 = vmatmul.mubr.bf16.vlgmr.msra.gmra.mxu0 %v4204_v28  ;;  %v1283_v33 = vmax.f32 %v1277_v52, 0.0  ;;  %v3705_v52 = vld [vmem:[#allocation8 + $0x2e8] sm:$0xff]  }
 0x1d5   : > { %v4208_v40 = vld [vmem:[#allocation3 + $0x8] ss:$12 sps:$4 sm:$0xff]   ;;  %3222 = vmatpush3.bf16.msra.mxu0 %v3651_v30  ;;  %v3706_v30 = vld [vmem:[#allocation8 + $0x2a8] sm:$0xff]  }
 0x1d6   : > { %v3161_v44 = vpack.c.bf16 %v1283_v33, %v1282_v7  ;;  %3223 = vmatprep.subr.bf16.mxu0 %v3654_v50  ;;  %3429 = vmatprep.mubr.bf16.mxu1 %v4208_v40  ;;  %v3709_v50 = vld [vmem:[#allocation8 + $0x2a0] sm:$0xff]   ;;  %v3712_v33 = vld [vmem:[#allocation8 + $0x298] sm:$0xff]  }
 0x1d7   : > { %v3710_v7 = vld [vmem:[#allocation8 + $0x260] sm:$0xff]  }
 0x1d8   : > { %1333 = vst [vmem:[#allocation3 + $0x18] sm:$0x11] %v3161_v44  ;;  %v3713_v44 = vld [vmem:[#allocation8 + $0x258] sm:$0xff]  }
 0x1d9   : > { %3224 = vmatpush3.bf16.msra.mxu0 %v3655_v42  ;;  %v3708_v42 = vld [vmem:[#allocation8 + $0x2e0] sm:$0xff]  }
 0x1da   : > { %v4211_v20 = vld [vmem:[#allocation3 + $0x20] ss:$0 sps:$4 sm:$0xff]   ;;  %3225 = vmatprep.subr.bf16.mxu0 %v3657_v55  ;;  %v3715_v55 = vld [vmem:[#allocation8 + $0x290] sm:$0xff]  }
 0x1db   : > { %3430 = vmatmul.mubr.bf16.vlgmr.msra.gmra.mxu1 %v4211_v20 }
 0x1dc   : > { %3434 = vmatpush3.bf16.msra.mxu1 %v4107_v35  ;;  %3449 = vmatprep.mubr.bf16.mxu1 %v4208_v40  ;;  %v3665_v35 = vld [vmem:[#allocation8 + $0xd8] sm:$0xff]  }
 0x1dd   : > { %3435 = vmatprep.subr.bf16.mxu1 %v3653_v46  ;;  %3226 = vmatpush3.bf16.msra.mxu0 %v3659_v17  ;;  %v3711_v17 = vld [vmem:[#allocation8 + $0x2d8] sm:$0xff]  }
 0x1de   : > { %3227 = vmatprep.subr.bf16.mxu0 %v3661_v34  ;;  %v3718_v34 = vld [vmem:[#allocation8 + $0x288] sm:$0xff]  }
 0x1df   : > { %v1347_v1 = vld [vmem:[#allocation3 + $0x18] sm:$0xff] }
 0x1e0   : > { %v4216_v36 = vcombine.high %v1347_v1, %v1347_v1  ;;  %v4218_v58 = vcombine.low %v1347_v1, %v1347_v1  ;;  %3436 = vmatpush3.bf16.msra.mxu1 %v3653_v46  ;;  %v3716_v46 = vld [vmem:[#allocation8 + $0x250] sm:$0xff]   ;;  %v3719_v1 = vld [vmem:[#allocation8 + $0x248] sm:$0xff]  }
 0x1e1   : > { %3437 = vmatprep.subr.bf16.mxu1 %v3656_v49  ;;  %3228 = vmatpush3.bf16.msra.mxu0 %v3662_v60  ;;  %v3721_v60 = vld [vmem:[#allocation8 + $0x280] sm:$0xff]  }
 0x1e2   : > { %1608 = vmatprep.mubr.bf16.mxu0 %v4216_v36  ;;  %3229 = vmatprep.subr.bf16.mxu0 %v3664_v37  ;;  %v3717_v37 = vld [vmem:[#allocation8 + $0x2c8] sm:$0xff]  }
 0x1e3   : > { %1609 = vmatmul.mubr.bf16.gmra.mxu0 %v4218_v58 }
 0x1e4   : > { %1896 = vmatprep.mubr.bf16.mxu0 %v4202_v41  ;;  %3438 = vmatpush3.bf16.msra.mxu1 %v3656_v49  ;;  %v3714_v49 = vld [vmem:[#allocation8 + $0x2d0] sm:$0xff]  }
 0x1e5   : > { %3439 = vmatprep.subr.bf16.mxu1 %v3660_v5  ;;  %3230 = vmatpush3.bf16.msra.mxu0 %v3665_v35  ;;  %v3724_v35 = vld [vmem:[#allocation8 + $0x378] sm:$0xff]  }
 0x1e6   : > { %3231 = vmatprep.subr.bf16.mxu0 %v3667_v61  ;;  %v3720_v61 = vld [vmem:[#allocation8 + $0x2c0] sm:$0xff]  }
 0x1e8   : > { %3440 = vmatpush3.bf16.msra.mxu1 %v3660_v5  ;;  %v3722_v5 = vld [vmem:[#allocation8 + $0x240] sm:$0xff]  }
 0x1e9   : > { %3441 = vmatprep.subr.bf16.mxu1 %v3663_v39  ;;  %3232 = vmatpush3.bf16.msra.mxu0 %v3668_v43  ;;  %v3727_v43 = vld [vmem:[#allocation8 + $0x370] sm:$0xff]  }
 0x1ea   : > { %3233 = vmatprep.subr.bf16.mxu0 %v3670_v63  ;;  %v3723_v63 = vld [vmem:[#allocation8 + $0x3b8] sm:$0xff]  }
 0x1ec   : > { %3442 = vmatpush3.bf16.msra.mxu1 %v3663_v39  ;;  %v3725_v39 = vld [vmem:[#allocation8 + $0x338] sm:$0xff]  }
 0x1ed   : > { %3443 = vmatprep.subr.bf16.mxu1 %v3666_v8  ;;  %3234 = vmatpush3.bf16.msra.mxu0 %v3671_v45  ;;  %v3726_v45 = vld [vmem:[#allocation8 + $0x3b0] sm:$0xff]  }
 0x1ee   : > { %3235 = vmatprep.subr.bf16.mxu0 %v3673_v47  ;;  %v3730_v47 = vld [vmem:[#allocation8 + $0x368] sm:$0xff]  }
 0x1f0   : > { %3444 = vmatpush3.bf16.msra.mxu1 %v3666_v8  ;;  %v3728_v8 = vld [vmem:[#allocation8 + $0x330] sm:$0xff]  }
 0x1f1   : > { %3445 = vmatprep.subr.bf16.mxu1 %v3669_v48  ;;  %3236 = vmatpush3.bf16.msra.mxu0 %v3674_v0  ;;  %v3733_v0 = vld [vmem:[#allocation8 + $0x360] sm:$0xff]  }
 0x1f2   : > { %3259 = vmatprep.subr.bf16.mxu0 %v3676_v51  ;;  %v3729_v51 = vld [vmem:[#allocation8 + $0x3a8] sm:$0xff]  }
 0x1f4   : > { %3446 = vmatpush3.bf16.msra.mxu1 %v3669_v48  ;;  %1897 = vmatmul.mubr.bf16.vlgmr.msra.gmra.mxu0 %v4204_v28  ;;  %v3731_v48 = vld [vmem:[#allocation8 + $0x328] sm:$0xff]  }
 0x1f5   : > { %3447 = vmatprep.subr.bf16.mxu1 %v3672_v53  ;;  %1903 = vmatprep.mubr.bf16.mxu0 %v4216_v36 }
 0x1f6   : > { %3260 = vmatpush3.bf16.msra.mxu0 %v3677_v54  ;;  %v3736_v54 = vld [vmem:[#allocation8 + $0x358] sm:$0xff]  }
 0x1f7   : > { %3261 = vmatprep.subr.bf16.mxu0 %v3679_v56  ;;  %v3732_v56 = vld [vmem:[#allocation8 + $0x3a0] sm:$0xff]  }
 0x1f8   : > { %3448 = vmatpush3.bf16.msra.mxu1 %v3672_v53  ;;  %v3734_v53 = vld [vmem:[#allocation8 + $0x320] sm:$0xff]  }
 0x1f9   : > { %3453 = vmatprep.subr.bf16.mxu1 %v3675_v32 }
 0x1fa   : > { %3262 = vmatpush3.bf16.msra.mxu0 %v3680_v59  ;;  %v3735_v59 = vld [vmem:[#allocation8 + $0x398] sm:$0xff]  }
 0x1fb   : > { %3450 = vmatmul.mubr.bf16.vlgmr.msra.gmra.mxu1 %v4211_v20  ;;  %3263 = vmatprep.subr.bf16.mxu0 %v3682_v62  ;;  %v3742_v62 = vld [vmem:[#allocation8 + $0x348] sm:$0xff]  }
 0x1fc   : > { %3454 = vmatpush3.bf16.msra.mxu1 %v3675_v32  ;;  %3469 = vmatprep.mubr.bf16.mxu1 %v4208_v40  ;;  %v3737_v32 = vld [vmem:[#allocation8 + $0x318] sm:$0xff]  }
 0x1fd   : > { %3455 = vmatprep.subr.bf16.mxu1 %v3678_v57  ;;  %1904 = vmatmul.mubr.bf16.gmra.mxu0 %v4218_v58 }
 0x1fe   : > { %3264 = vmatpush3.bf16.msra.mxu0 %v3683_v3  ;;  %2184 = vmatprep.mubr.bf16.mxu0 %v4202_v41  ;;  %v3743_v3 = vld [vmem:[#allocation8 + $0x308] sm:$0xff]  }
 0x1ff   : > { %3265 = vmatprep.subr.bf16.mxu0 %v3685_v4  ;;  %v3745_v4 = vld [vmem:[#allocation8 + $0x340] sm:$0xff]  }
 0x200   : > { %3456 = vmatpush3.bf16.msra.mxu1 %v3678_v57  ;;  %v3740_v57 = vld [vmem:[#allocation8 + $0x310] sm:$0xff]  }
 0x201   : > { %3457 = vmatprep.subr.bf16.mxu1 %v3681_v6 }
 0x202   : > { %3266 = vmatpush3.bf16.msra.mxu0 %v3686_v29  ;;  %v3746_v29 = vld [vmem:[#allocation8 + $0x300] sm:$0xff]  }
 0x203   : > { %3267 = vmatprep.subr.bf16.mxu0 %v3688_v2  ;;  %v3744_v2 = vld [vmem:[#allocation8 + $0x380] sm:$0xff]  }
 0x204   : > { %3458 = vmatpush3.bf16.msra.mxu1 %v3681_v6  ;;  %v3741_v6 = vld [vmem:[#allocation8 + $0x388] sm:$0xff]  }
 0x205   : > { %3459 = vmatprep.subr.bf16.mxu1 %v3684_v9 }
 0x206   : > { %3268 = vmatpush3.bf16.msra.mxu0 %v3689_v10 }
 0x207   : > { %3269 = vmatprep.subr.bf16.mxu0 %v3691_v11 }
 0x208   : > { %3460 = vmatpush3.bf16.msra.mxu1 %v3684_v9 }
 0x209   : > { %3461 = vmatprep.subr.bf16.mxu1 %v3687_v12 }
 0x20a   : > { %3270 = vmatpush3.bf16.msra.mxu0 %v3692_v13 }
 0x20b   : > { %3271 = vmatprep.subr.bf16.mxu0 %v3694_v14 }
 0x20c   : > { %3462 = vmatpush3.bf16.msra.mxu1 %v3687_v12 }
 0x20d   : > { %3463 = vmatprep.subr.bf16.mxu1 %v3690_v31 }
 0x20e   : > { %3272 = vmatpush3.bf16.msra.mxu0 %v3695_v15 }
 0x20f   : > { %3273 = vmatprep.subr.bf16.mxu0 %v3697_v16 }
 0x210   : > { %3464 = vmatpush3.bf16.msra.mxu1 %v3690_v31 }
 0x211   : > { %3465 = vmatprep.subr.bf16.mxu1 %v3693_v18 }
 0x212   : > { %3274 = vmatpush3.bf16.msra.mxu0 %v3698_v19 }
 0x213   : > { %3297 = vmatprep.subr.bf16.mxu0 %v3700_v21 }
 0x214   : > { %3466 = vmatpush3.bf16.msra.mxu1 %v3693_v18 }
 0x215   : > { %3467 = vmatprep.subr.bf16.mxu1 %v3696_v22  ;;  %2185 = vmatmul.mubr.bf16.vlgmr.msra.gmra.mxu0 %v4204_v28 }
 0x216   : > { %2191 = vmatprep.mubr.bf16.mxu0 %v4216_v36  ;;  %3298 = vmatpush3.bf16.msra.mxu0 %v3701_v23 }
 0x217   : > { %3299 = vmatprep.subr.bf16.mxu0 %v3703_v24 }
 0x218   : > { %3468 = vmatpush3.bf16.msra.mxu1 %v3696_v22 }
 0x219   : > { %3473 = vmatprep.subr.bf16.mxu1 %v3699_v25 }
 0x21a   : > { %3300 = vmatpush3.bf16.msra.mxu0 %v3704_v26 }
 0x21b   : > { %3470 = vmatmul.mubr.bf16.vlgmr.msra.gmra.mxu1 %v4211_v20  ;;  %3301 = vmatprep.subr.bf16.mxu0 %v3706_v30 }
 0x21c   : > { %3474 = vmatpush3.bf16.msra.mxu1 %v3699_v25  ;;  %3489 = vmatprep.mubr.bf16.mxu1 %v4208_v40 }
 0x21d   : > { %3475 = vmatprep.subr.bf16.mxu1 %v3702_v27  ;;  %2192 = vmatmul.mubr.bf16.gmra.mxu0 %v4218_v58 }
 0x21e   : > { %3302 = vmatpush3.bf16.msra.mxu0 %v3707_v38  ;;  %2480 = vmatprep.mubr.bf16.mxu0 %v4202_v41 }
 0x21f   : > { %3303 = vmatprep.subr.bf16.mxu0 %v3709_v50 }
 0x220   : > { %3476 = vmatpush3.bf16.msra.mxu1 %v3702_v27 }
 0x221   : > { %3477 = vmatprep.subr.bf16.mxu1 %v3705_v52 }
 0x222   : > { %3304 = vmatpush3.bf16.msra.mxu0 %v3710_v7 }
 0x223   : > { %3305 = vmatprep.subr.bf16.mxu0 %v3712_v33 }
 0x224   : > { %3478 = vmatpush3.bf16.msra.mxu1 %v3705_v52 }
 0x225   : > { %3479 = vmatprep.subr.bf16.mxu1 %v3708_v42 }
 0x226   : > { %3306 = vmatpush3.bf16.msra.mxu0 %v3713_v44 }
 0x227   : > { %3307 = vmatprep.subr.bf16.mxu0 %v3715_v55 }
 0x228   : > { %3480 = vmatpush3.bf16.msra.mxu1 %v3708_v42  ;;  %v3026_v42 = vld [vmem:[%s4294_s5] ss:$0 sm:$0xff] }
 0x229   : > { %3481 = vmatprep.subr.bf16.mxu1 %v3711_v17 }
 0x22a   : > { %3308 = vmatpush3.bf16.msra.mxu0 %v3716_v46 }
 0x22b   : > { %3309 = vmatprep.subr.bf16.mxu0 %v3718_v34 }
 0x22c   : > { %3482 = vmatpush3.bf16.msra.mxu1 %v3711_v17 }
 0x22d   : > { %3483 = vmatprep.subr.bf16.mxu1 %v3714_v49 }
 0x22e   : > { %3310 = vmatpush3.bf16.msra.mxu0 %v3719_v1 }
 0x22f   : > { %3311 = vmatprep.subr.bf16.mxu0 %v3721_v60 }
 0x230   : > { %3484 = vmatpush3.bf16.msra.mxu1 %v3714_v49 }
 0x231   : > { %3485 = vmatprep.subr.bf16.mxu1 %v3717_v37 }
 0x232   : > { %3312 = vmatpush3.bf16.msra.mxu0 %v3722_v5 }
 0x233   : > { %3335 = vmatprep.subr.bf16.mxu0 %v3724_v35 }
 0x234   : > { %3486 = vmatpush3.bf16.msra.mxu1 %v3717_v37 }
 0x235   : > { %3487 = vmatprep.subr.bf16.mxu1 %v3720_v61  ;;  %2481 = vmatmul.mubr.bf16.vlgmr.msra.gmra.mxu0 %v4204_v28 }
 0x236   : > { %2487 = vmatprep.mubr.bf16.mxu0 %v4216_v36  ;;  %3336 = vmatpush3.bf16.msra.mxu0 %v3725_v39 }
 0x237   : > { %3337 = vmatprep.subr.bf16.mxu0 %v3727_v43 }
 0x238   : > { %3488 = vmatpush3.bf16.msra.mxu1 %v3720_v61 }
 0x239   : > { %3493 = vmatprep.subr.bf16.mxu1 %v3723_v63 }
 0x23a   : > { %3338 = vmatpush3.bf16.msra.mxu0 %v3728_v8 }
 0x23b   : > { %3490 = vmatmul.mubr.bf16.vlgmr.msra.gmra.mxu1 %v4211_v20  ;;  %3339 = vmatprep.subr.bf16.mxu0 %v3730_v47 }
 0x23c   : > { %3494 = vmatpush3.bf16.msra.mxu1 %v3723_v63  ;;  %3509 = vmatprep.mubr.bf16.mxu1 %v4208_v40  ;;  %v3739_v40 = vld [vmem:[#allocation8 + $0x350] sm:$0xff]  }
 0x23d   : > { %3495 = vmatprep.subr.bf16.mxu1 %v3726_v45  ;;  %2488 = vmatmul.mubr.bf16.gmra.mxu0 %v4218_v58 }
 0x23e   : > { %3340 = vmatpush3.bf16.msra.mxu0 %v3731_v48  ;;  %2776 = vmatprep.mubr.bf16.mxu0 %v4202_v41  ;;  %v3738_v41 = vld [vmem:[#allocation8 + $0x390] sm:$0xff]  }
 0x23f   : > { %3341 = vmatprep.subr.bf16.mxu0 %v3733_v0 }
 0x240   : > { %3496 = vmatpush3.bf16.msra.mxu1 %v3726_v45 }
 0x241   : > { %3497 = vmatprep.subr.bf16.mxu1 %v3729_v51 }
 0x242   : > { %3342 = vmatpush3.bf16.msra.mxu0 %v3734_v53 }
 0x243   : > { %3343 = vmatprep.subr.bf16.mxu0 %v3736_v54 }
 0x244   : > { %3498 = vmatpush3.bf16.msra.mxu1 %v3729_v51 }
 0x245   : > { %3499 = vmatprep.subr.bf16.mxu1 %v3732_v56 }
 0x246   : > { %3344 = vmatpush3.bf16.msra.mxu0 %v3737_v32 }
 0x247   : > { %3345 = vmatprep.subr.bf16.mxu0 %v3739_v40 }
 0x248   : > { %3500 = vmatpush3.bf16.msra.mxu1 %v3732_v56 }
 0x249   : > { %3501 = vmatprep.subr.bf16.mxu1 %v3735_v59 }
 0x24a   : > { %3346 = vmatpush3.bf16.msra.mxu0 %v3740_v57 }
 0x24b   : > { %3347 = vmatprep.subr.bf16.mxu0 %v3742_v62 }
 0x24c   : > { %3502 = vmatpush3.bf16.msra.mxu1 %v3735_v59 }
 0x24d   : > { %3503 = vmatprep.subr.bf16.mxu1 %v3738_v41 }
 0x24e   : > { %3348 = vmatpush3.bf16.msra.mxu0 %v3743_v3 }
 0x24f   : > { %3349 = vmatprep.subr.bf16.mxu0 %v3745_v4 }
 0x250   : > { %3504 = vmatpush3.bf16.msra.mxu1 %v3738_v41 }
 0x251   : > { %3505 = vmatprep.subr.bf16.mxu1 %v3741_v6 }
 0x252   : > { %3350 = vmatpush3.bf16.msra.mxu0 %v3746_v29 }
 0x254   : > { %3506 = vmatpush3.bf16.msra.mxu1 %v3741_v6 }
 0x255   : > { %3507 = vmatprep.subr.bf16.mxu1 %v3744_v2  ;;  %2777 = vmatmul.mubr.bf16.vlgmr.msra.gmra.mxu0 %v4204_v28 }
 0x256   : > { %2783 = vmatprep.mubr.bf16.mxu0 %v4216_v36 }
 0x258   : > { %3508 = vmatpush3.bf16.msra.mxu1 %v3744_v2 }
 0x25b   : > { %3510 = vmatmul.mubr.bf16.vlgmr.msra.gmra.mxu1 %v4211_v20 }
 0x25d   : > { %2784 = vmatmul.mubr.bf16.gmra.mxu0 %v4218_v58 }
 0x294   : > { %v3199_v9 = vpop.f32.mrf.mxu0 }
 0x296   : > { %v3200_v10 = vpop.f32.mrf.mxu0 }
 0x297   : > { %v3201_v11 = vadd.f32 %v3200_v10, %v3199_v9 }
 0x298   : > { %v3202_v12 = vpop.f32.mrf.mxu0 }
 0x29a   : > { %v3203_v13 = vpop.f32.mrf.mxu0 }
 0x29b   : > { %v3204_v14 = vadd.f32 %v3203_v13, %v3202_v12  ;;  %v3431_v31 = vpop.f32.mrf.mxu1 }
 0x29d   : > { %v1649_v15 = vpop.f32.mrf.mxu1 }
 0x29e   : > { %v1650_v16 = vadd.f32 %v3201_v11, %v1649_v15 }
 0x29f   : > { %v3432_v18 = vpop.f32.mrf.mxu1 }
 0x2a0   : > { %v1665_v22 = vrot.slane %v1650_v16, 7 }
 0x2a1   : > { %v1652_v19 = vpop.f32.mrf.mxu1 }
 0x2a2   : > { %v1653_v21 = vadd.f32 %v3204_v14, %v1652_v19 }
 0x2a3   : > { %v3205_v28 = vpop.f32.mrf.mxu0 }
 0x2a4   : > { %v1666_v36 = vrot.slane %v1653_v21, 7 }
 0x2a5   : > { %v3206_v23 = vpop.f32.mrf.mxu0 }
 0x2a6   : > { %v1667_v20 = vsel %vm730_vm12, %v1665_v22, %v1666_v36 }
 0x2a7   : > { %v3208_v24 = vpop.f32.mrf.mxu0  ;;  %v1669_v17 = vadd.f32 %v3026_v42, %v1667_v20 }
 0x2a9   : > { %v3209_v58 = vpop.f32.mrf.mxu0 }
 0x2b4   : > { %v3237_v25 = vpop.f32.mrf.mxu0 }
 0x2b6   : > { %v3238_v26 = vpop.f32.mrf.mxu0 }
 0x2b8   : > { %v3240_v27 = vpop.f32.mrf.mxu0 }
 0x2ba   : > { %v3241_v38 = vpop.f32.mrf.mxu0 }
 0x2bb   : > { %v3451_v30 = vpop.f32.mrf.mxu1  ;;  %v3242_v52 = vadd.f32 %v3241_v38, %v3240_v27 }
 0x2bd   : > { %v1944_v50 = vpop.f32.mrf.mxu1  ;;  %v3243_v7 = vpop.f32.mrf.mxu0 }
 0x2bf   : > { %v3452_v33 = vpop.f32.mrf.mxu1  ;;  %v3244_v44 = vpop.f32.mrf.mxu0 }
 0x2c1   : > { %v1946_v55 = vpop.f32.mrf.mxu1  ;;  %v3246_v34 = vpop.f32.mrf.mxu0 }
 0x2c2   : > { %v1947_v46 = vadd.f32 %v3242_v52, %v1946_v55 }
 0x2c3   : > { %v3247_v1 = vpop.f32.mrf.mxu0 }
 0x2c4   : > { %v1957_v49 = vadd.f32 %v1947_v46, %v1669_v17 }
 0x2d5   : > { %v3275_v60 = vpop.f32.mrf.mxu0 }
 0x2d7   : > { %v3276_v37 = vpop.f32.mrf.mxu0 }
 0x2d9   : > { %v3278_v5 = vpop.f32.mrf.mxu0 }
 0x2db   : > { %v3471_v35 = vpop.f32.mrf.mxu1  ;;  %v3279_v61 = vpop.f32.mrf.mxu0 }
 0x2dc   : > { %v3280_v43 = vadd.f32 %v3279_v61, %v3278_v5 }
 0x2dd   : > { %v2233_v39 = vpop.f32.mrf.mxu1  ;;  %v3281_v63 = vpop.f32.mrf.mxu0 }
 0x2df   : > { %v3472_v8 = vpop.f32.mrf.mxu1  ;;  %v3282_v45 = vpop.f32.mrf.mxu0 }
 0x2e0   : > { %v3283_v48 = vadd.f32 %v3282_v45, %v3281_v63 }
 0x2e1   : > { %v2235_v47 = vpop.f32.mrf.mxu1  ;;  %v3284_v51 = vpop.f32.mrf.mxu0 }
 0x2e2   : > { %v2236_v0 = vadd.f32 %v3280_v43, %v2235_v47  ;;  %v2241_v53 = vadd.f32 %v3471_v35, %v3283_v48 }
 0x2e3   : > { %v3285_v56 = vpop.f32.mrf.mxu0 }
 0x2e4   : > { %v2249_v54 = vrot.slane %v2236_v0, 1  ;;  %v2250_v32 = vrot.slane %v2241_v53, 1 }
 0x2e6   : > { %v2251_v40 = vsel %vm1068_vm14, %v2249_v54, %v2250_v32 }
 0x2e7   : > { %v2253_v59 = vadd.f32 %v2251_v40, %v1957_v49 }
 0x2f5   : > { %v3313_v57 = vpop.f32.mrf.mxu0 }
 0x2f7   : > { %v3314_v62 = vpop.f32.mrf.mxu0 }
 0x2f9   : > { %v3316_v41 = vpop.f32.mrf.mxu0 }
 0x2fb   : > { %v3491_v3 = vpop.f32.mrf.mxu1  ;;  %v3317_v4 = vpop.f32.mrf.mxu0 }
 0x2fc   : > { %v3318_v31 = vadd.f32 %v3317_v4, %v3316_v41 }
 0x2fd   : > { %v2529_v6 = vpop.f32.mrf.mxu1  ;;  %v3319_v29 = vpop.f32.mrf.mxu0 }
 0x2ff   : > { %v3492_v2 = vpop.f32.mrf.mxu1  ;;  %v3320_v9 = vpop.f32.mrf.mxu0 }
 0x300   : > { %v3321_v15 = vadd.f32 %v3320_v9, %v3319_v29 }
 0x301   : > { %v3322_v10 = vpop.f32.mrf.mxu0  ;;  %v2531_v13 = vpop.f32.mrf.mxu1 }
 0x302   : > { %v2532_v18 = vadd.f32 %v3318_v31, %v2531_v13  ;;  %v2537_v28 = vadd.f32 %v3491_v3, %v3321_v15 }
 0x303   : > { %v3323_v11 = vpop.f32.mrf.mxu0 }
 0x304   : > { %v2545_v23 = vrot.slane %v2532_v18, 2  ;;  %v2546_v25 = vrot.slane %v2537_v28, 2 }
 0x306   : > { %v2547_v50 = vsel %vm1245_vm15, %v2545_v23, %v2546_v25 }
 0x307   : > { %v2549_v44 = vadd.f32 %v2547_v50, %v2253_v59 }
 0x315   : > { %v3351_v12 = vpop.f32.mrf.mxu0 }
 0x317   : > { %v3352_v14 = vpop.f32.mrf.mxu0 }
 0x319   : > { %v3354_v16 = vpop.f32.mrf.mxu0 }
 0x31b   : > { %v3511_v19 = vpop.f32.mrf.mxu1  ;;  %v3355_v21 = vpop.f32.mrf.mxu0 }
 0x31c   : > { %v3356_v24 = vadd.f32 %v3355_v21, %v3354_v16 }
 0x31d   : > { %v2825_v22 = vpop.f32.mrf.mxu1  ;;  %v3357_v36 = vpop.f32.mrf.mxu0 }
 0x31f   : > { %v3512_v20 = vpop.f32.mrf.mxu1  ;;  %v3358_v58 = vpop.f32.mrf.mxu0 }
 0x320   : > { %v3359_v27 = vadd.f32 %v3358_v58, %v3357_v36 }
 0x321   : > { %v2827_v26 = vpop.f32.mrf.mxu1  ;;  %v3360_v38 = vpop.f32.mrf.mxu0 }
 0x322   : > { %v2828_v30 = vadd.f32 %v3356_v24, %v2827_v26  ;;  %v2833_v52 = vadd.f32 %v3511_v19, %v3359_v27 }
 0x323   : > { %v3361_v33 = vpop.f32.mrf.mxu0 }
 0x324   : > { %v2842_v7 = vrot.slane %v2828_v30, 3  ;;  %v2843_v42 = vrot.slane %v2833_v52, 3 }
 0x326   : > { %v2844_v55 = vsel %vm2841_vm0, %v2842_v7, %v2843_v42 }
 0x327   : > { %v2846_v17 = vadd.f32 %v2844_v55, %v2549_v44 }
 0x329   : > { %2847 = vst [vmem:[%s289_s11] sm:$0xff] %v2846_v17 }
 0x32a   : > { %3812 = shalt.err (!%p3809_p3)
}
 0x32b   : > { %s3813_s20 = scalar_lea.hbm %s2860_s15, 128  ;;  %s3817_s29 = scalar_lea.hbm %s4295_s6, 256 }
 0x32c   : > { %p3814_p2 = scmp.ne.s32.totalorder %s2860_s15, %s3813_s20  ;;  %p3818_p6 = scmp.lt.s32.totalorder %s2860_s15, %s4295_s6 }
 0x32d   : > { %p3819_p9 = scmp.lt.s32.totalorder %s3817_s29, %s3813_s20 }
 0x32e   : > { %p3815_p4 = pnand %p3814_p2, %p3953_p5 }
 0x32f   : > { %p3820_p7 = por %p3819_p9, %p3818_p6 }
 0x330   : > { %p3816_p13 = pneg %p3815_p4 }
 0x332   : > { %p3821_p10 = pnand %p3820_p7, %p3816_p13 }
 0x334   : > { %3824 = shalt.err (!%p3821_p10)
}
 0x335   : > { %3521 = dma.vmem_to_hbm [thread:$0]  (%p3953_p5), %s2863_s12, 128, %s2860_s15, %s2849_s16  }
 0x336 PF: > { %p3538_p12 = scmp.ge.s32.totalorder %s3867_s24, 2  ;;  %s2874_s11 = sand.u32 1, %s3855_s21  }
 0x337   : > { %p4309_p8 = scmp.ne.s32.totalorder %s4298_s8, 0  ;;  %s2875_s13 = scalar_lea.sflag [#allocation7], %s2874_s11 }
 0x339   : > { %p3531_p11 = pnand %p3538_p12, %p4309_p8 }
 0x33b   : > { %p3532_p0 = pneg %p3531_p11 }
 0x33d   : > { %3850 = dma.done.wait (%p3532_p0), %s2875_s13, 128  }
 0x33e   : > { %3852 = vsyncadd (%p3532_p0), %s2875_s13, 4294967168  ;;  %p18_p1 = scmp.ge.s32.totalorder %s3940_s27, 4   ;;  %s4310_s21 = smov %s3859_s22 }
 0x33f   : > { %s4311_s22 = smov %s3863_s23  ;;  %s4312_s23 = smov %s3951_s30 }
 0x340   : > { %s4313_s24 = smov %s3940_s27  ;;  %20 = sbr.rel (!%p18_p1) target bundleno = 5 (0x5), region = 99 }
 0x345   :  { %2880 = vsyncpa [#allocation6], 1 }
 0x346   :  { %2882 = vsyncpa [#allocation6 + $0x1], 1 }
 0x347   :  { %2883 = vsyncpa [#allocation9], 1 }
 0x348   :  { %2884 = vsyncpa [#allocation7], 1 }
 0x349   :  { %2886 = vsyncpa [#allocation7 + $0x1], 1 }

</bundles_post_ra>
